<compile_context>
chip_gen: v7x
topology: tpu7x:2x2x1
jax: 0.10.0
libtpu: 0.0.40
codegen_flags: <defaults>
</compile_context>

<pallas_src>
import functools
import numpy as np
import jax
import jax.numpy as jnp
from jax.experimental import pallas as pl
from jax.experimental.pallas import tpu as pltpu


POOL_SIZES = (1, 2, 3, 6)


def _round_up(x, m):
    return ((x + m - 1) // m) * m


def _pick_tile(n, cap, mult=8):
    """Largest multiple of `mult` that divides n and is <= cap.

    `n` must itself be a multiple of `mult` (all call sites guarantee it),
    so the result always divides n exactly — no tile-padding waste.
    """
    best = mult
    t = mult
    lim = min(n, cap)
    while t <= lim:
        if n % t == 0:
            best = t
        t += mult
    return best


# ---------------------------------------------------------------------------
# Trace-time dense matrices (adaptive pooling / bilinear align_corners=True)
# ---------------------------------------------------------------------------

def _adaptive_pool_matrix(n_in, n_out):
    """(n_out, n_in) row-stochastic matrix implementing AdaptiveAvgPool1d."""
    m = np.zeros((n_out, n_in), np.float32)
    for i in range(n_out):
        start = (i * n_in) // n_out
        end = -((-(i + 1) * n_in) // n_out)  # ceil
        m[i, start:end] = 1.0 / (end - start)
    return m


def _bilinear_matrix(n_in, n_out):
    """(n_out, n_in) bilinear interpolation matrix, align_corners=True."""
    w = np.zeros((n_out, n_in), np.float32)
    if n_out == 1 or n_in == 1:
        w[:, 0] = 1.0
        return w
    for i in range(n_out):
        pos = i * (n_in - 1) / (n_out - 1)
        lo = min(int(np.floor(pos)), n_in - 2)
        frac = pos - lo
        w[i, lo] += 1.0 - frac
        w[i, lo + 1] += frac
    return w


# ---------------------------------------------------------------------------
# Pallas kernel 1: all pyramid-branch 1x1 convs (+folded BN +ReLU), one call
# ---------------------------------------------------------------------------

def _branch_conv_kernel(a_ref, w_ref, b_ref, o_ref, acc_ref):
    k = pl.program_id(3)

    @pl.when(k == 0)
    def _():
        acc_ref[...] = jnp.zeros_like(acc_ref)

    # bf16 x bf16 -> fp32 accumulation on the MXU.
    acc_ref[...] += jnp.dot(a_ref[0], w_ref[0],
                            preferred_element_type=jnp.float32)

    @pl.when(k == pl.num_programs(3) - 1)
    def _():
        # BN scale is pre-folded into the weights; only the shift remains.
        o_ref[0] = jnp.maximum(acc_ref[...] + b_ref[0], 0.0)


def _branch_conv(a, w, b):
    """a: (B, Mp, Kp) bf16, w: (B, Kp, Np) bf16, b: (B, 1, Np) f32
    -> (B, Mp, Np) f32 = relu(a @ w + b) per branch, one pallas_call."""
    nb, mp, kp = a.shape
    np_out = w.shape[2]
    tm = _pick_tile(mp, 256, 8)
    tk = _pick_tile(kp, 2048, 128)
    tn = _pick_tile(np_out, 256, 128)
    grid = (nb, mp // tm, np_out // tn, kp // tk)
    return pl.pallas_call(
        _branch_conv_kernel,
        out_shape=jax.ShapeDtypeStruct((nb, mp, np_out), jnp.float32),
        grid_spec=pltpu.PrefetchScalarGridSpec(
            num_scalar_prefetch=0,
            grid=grid,
            in_specs=[
                pl.BlockSpec((1, tm, tk), lambda bb, i, j, k: (bb, i, k)),
                pl.BlockSpec((1, tk, tn), lambda bb, i, j, k: (bb, k, j)),
                pl.BlockSpec((1, 1, tn), lambda bb, i, j, k: (bb, 0, j)),
            ],
            out_specs=pl.BlockSpec((1, tm, tn), lambda bb, i, j, k: (bb, i, j)),
            scratch_shapes=[pltpu.VMEM((tm, tn), jnp.float32)],
        ),
        compiler_params=pltpu.CompilerParams(
            dimension_semantics=("parallel", "parallel", "parallel",
                                 "arbitrary")),
    )(a, w, b)


# ---------------------------------------------------------------------------
# Pallas kernel 2: fused bilinear upsample (all branches) + channel concat
# ---------------------------------------------------------------------------

def _upsample_concat_kernel(x_ref, g_ref, y_ref, o_ref, *, cin, cout, nb):
    # Pass-through of the original features into channels [0, cin).
    o_ref[0, :, :cin] = x_ref[0]
    # Each branch: (rows, slots) @ (slots, cout) on the MXU, written directly
    # into its channel stripe of the lane-dense output block.
    for b in range(nb):
        u = jnp.dot(g_ref[b], y_ref[b, 0], preferred_element_type=jnp.float32)
        o_ref[0, :, cin + b * cout: cin + (b + 1) * cout] = u


def _upsample_concat(xf, g, y, *, tr, cin, cout, ctot):
    n, mspp, _ = xf.shape
    nb, _, nslots = g.shape
    grid = (n, mspp // tr)
    kern = functools.partial(_upsample_concat_kernel, cin=cin, cout=cout,
                             nb=nb)
    return pl.pallas_call(
        kern,
        out_shape=jax.ShapeDtypeStruct((n, mspp, ctot), jnp.float32),
        grid_spec=pltpu.PrefetchScalarGridSpec(
            num_scalar_prefetch=0,
            grid=grid,
            in_specs=[
                pl.BlockSpec((1, tr, cin), lambda i, r: (i, r, 0)),
                pl.BlockSpec((nb, tr, nslots), lambda i, r: (0, r, 0)),
                pl.BlockSpec((nb, 1, nslots, cout), lambda i, r: (0, i, 0, 0)),
            ],
            out_specs=pl.BlockSpec((1, tr, ctot), lambda i, r: (i, r, 0)),
        ),
        compiler_params=pltpu.CompilerParams(
            dimension_semantics=("parallel", "parallel")),
    )(xf, g, y)


# ---------------------------------------------------------------------------
# Parameters: conv weights with BN folded in, pre-padded & pre-cast ONCE.
# ---------------------------------------------------------------------------

def init_ppm_params(in_channels, pool_sizes=POOL_SIZES, seed=42):
    nb = len(pool_sizes)
    cout = in_channels // nb
    kp = _round_up(in_channels, 128)
    np_out = _round_up(cout, 128)
    key = jax.random.PRNGKey(seed)
    w_list, b_list = [], []
    w_f32, b_f32 = [], []
    for _ in pool_sizes:
        key, kw, kg, kb, km, kv = jax.random.split(key, 6)
        w = (jax.random.normal(kw, (in_channels, cout), jnp.float32)
             / np.sqrt(in_channels))
        gamma = 1.0 + 0.1 * jax.random.normal(kg, (cout,), jnp.float32)
        beta = 0.1 * jax.random.normal(kb, (cout,), jnp.float32)
        mean = 0.1 * jax.random.normal(km, (cout,), jnp.float32)
        var = 0.9 + 0.2 * jax.random.uniform(kv, (cout,), jnp.float32)
        scale = gamma / jnp.sqrt(var + 1e-5)
        w_fold = w * scale[None, :]          # BN scale folded into the weight
        bias = beta - mean * scale           # BN shift, applied in epilogue
        w_f32.append(w_fold)
        b_f32.append(bias)
        w_list.append(jnp.pad(w_fold, ((0, kp - in_channels),
                                       (0, np_out - cout))))
        b_list.append(jnp.pad(bias, (0, np_out - cout)))
    w_all = jnp.stack(w_list).astype(jnp.bfloat16)        # (nb, Kp, Np) bf16
    b_all = jnp.stack(b_list).reshape(nb, 1, np_out).astype(jnp.float32)
    return {"w": w_all, "b": b_all,
            # Unpadded fp32 copies, only used by the pure-JAX reference check.
            "w_f32": jnp.stack(w_f32), "b_f32": jnp.stack(b_f32)}


# ---------------------------------------------------------------------------
# Forward pass
# ---------------------------------------------------------------------------

def ppm_forward(params, x_nchw, pool_sizes=POOL_SIZES):
    nb = len(pool_sizes)
    n, cin, h, w = x_nchw.shape
    cout = cin // nb
    x = jnp.transpose(x_nchw, (0, 2, 3, 1)).astype(jnp.float32)   # NHWC

    s_pad = _round_up(max(pool_sizes), 8)
    nslots = s_pad * s_pad

    # Adaptive average pooling (tiny dense matrices, trace-time constants) and
    # per-branch combined bilinear matrix G: (H*W, nslots).
    a_slots, g_rows = [], []
    for s in pool_sizes:
        ph = _adaptive_pool_matrix(h, s)                           # (s, H)
        pw = _adaptive_pool_matrix(w, s)                           # (s, W)
        p = jnp.einsum("ph,nhwc->npwc", jnp.asarray(ph), x)
        p = jnp.einsum("qw,npwc->npqc", jnp.asarray(pw), p)        # (N,s,s,C)
        p = jnp.pad(p, ((0, 0), (0, s_pad - s), (0, s_pad - s), (0, 0)))
        a_slots.append(p.reshape(n, nslots, cin))
        whb = np.zeros((h, s_pad), np.float32)
        wwb = np.zeros((w, s_pad), np.float32)
        whb[:, :s] = _bilinear_matrix(s, h)                        # (H, s)
        wwb[:, :s] = _bilinear_matrix(s, w)                        # (W, s)
        g_rows.append(np.einsum("ip,jq->ijpq", whb, wwb).reshape(h * w,
                                                                 nslots))

    # Pack branch activations: (nb, N*nslots, Kp) in bf16 (weights are already
    # packed/padded/bf16 at init).
    kp = params["w"].shape[1]
    np_out = params["w"].shape[2]
    a = jnp.stack(a_slots).reshape(nb, n * nslots, cin)
    if kp > cin:
        a = jnp.pad(a, ((0, 0), (0, 0), (0, kp - cin)))
    a = a.astype(jnp.bfloat16)

    # Kernel 1: all four 1x1 conv + BN + ReLU branches in one pallas_call.
    y = _branch_conv(a, params["w"], params["b"])                  # f32
    y = y.reshape(nb, n, nslots, np_out)
    if np_out > cout:
        y = y[..., :cout]                                          # (nb,N,S,Co)

    # Kernel 2: fused bilinear upsample + channel concat, tiled over rows.
    g = jnp.asarray(np.stack(g_rows), jnp.float32)                 # (nb,H*W,S)
    msp = h * w
    xf = x.reshape(n, msp, cin)
    tr = _pick_tile(_round_up(msp, 8), 512, 8)
    mspp = _round_up(msp, tr)
    if mspp > msp:
        xf = jnp.pad(xf, ((0, 0), (0, mspp - msp), (0, 0)))
        g = jnp.pad(g, ((0, 0), (0, mspp - msp), (0, 0)))
    ctot = cin + nb * cout
    out = _upsample_concat(xf, g, y, tr=tr, cin=cin, cout=cout, ctot=ctot)
    out = out[:, :msp].reshape(n, h, w, ctot)
    return jnp.transpose(out, (0, 3, 1, 2))                        # NCHW


# ---------------------------------------------------------------------------
# Pure-JAX reference (fp32) for correctness checking.
# ---------------------------------------------------------------------------

def ppm_reference(params, x_nchw, pool_sizes=POOL_SIZES):
    n, cin, h, w = x_nchw.shape
    x = jnp.transpose(x_nchw, (0, 2, 3, 1)).astype(jnp.float32)    # NHWC
    feats = [x_nchw.astype(jnp.float32)]
    for bi, s in enumerate(pool_sizes):
        ph = jnp.asarray(_adaptive_pool_matrix(h, s))              # (s, H)
        pw = jnp.asarray(_adaptive_pool_matrix(w, s))              # (s, W)
        p = jnp.einsum("ph,nhwc->npwc", ph, x)
        p = jnp.einsum("qw,npwc->npqc", pw, p)                     # (N,s,s,C)
        z = jnp.maximum(
            jnp.einsum("npqc,cd->npqd", p, params["w_f32"][bi])
            + params["b_f32"][bi], 0.0)
        uh = jnp.asarray(_bilinear_matrix(s, h))                   # (H, s)
        uw = jnp.asarray(_bilinear_matrix(s, w))                   # (W, s)
        u = jnp.einsum("hp,npqd->nhqd", uh, z)
        u = jnp.einsum("wq,nhqd->nhwd", uw, u)                     # (N,H,W,Co)
        feats.append(jnp.transpose(u, (0, 3, 1, 2)))
    return jnp.concatenate(feats, axis=1)


# ---------------------------------------------------------------------------

if __name__ == "__main__":
    N, C, H, W = 2, 512, 16, 16        # in_channels divisible by len(POOL_SIZES)
    x = jax.random.normal(jax.random.PRNGKey(0), (N, C, H, W), jnp.float32)
    params = init_ppm_params(C, POOL_SIZES, seed=42)

    fwd = jax.jit(ppm_forward)
    out = jax.block_until_ready(fwd(params, x))

    ctot = C + len(POOL_SIZES) * (C // len(POOL_SIZES))
    assert out.shape == (N, ctot, H, W), out.shape
    assert bool(jnp.all(jnp.isfinite(out)))
    # The first C output channels must be the passthrough of x (concat).
    assert bool(jnp.allclose(out[:, :C], x, atol=0.0))
    # Full reference check (bf16 conv on the MXU -> generous tolerance).
    ref = ppm_reference(params, x, POOL_SIZES)
    assert bool(jnp.allclose(out, ref, atol=5e-2, rtol=5e-2)), (
        float(jnp.max(jnp.abs(out - ref))))
    print("KERNEL_OK")
</pallas_src>

<mosaic_0001>
module attributes {stable_mosaic.version = 11 : i64} {
  func.func @_branch_conv_kernel(%arg0: i32, %arg1: i32, %arg2: i32, %arg3: i32, %arg4: memref<1x128x512xbf16, #tpu.memory_space<vmem>>, %arg5: memref<1x512x128xbf16, #tpu.memory_space<vmem>>, %arg6: memref<1x1x128xf32, #tpu.memory_space<vmem>>, %arg7: memref<1x128x128xf32, #tpu.memory_space<vmem>>, %arg8: memref<128x128xf32, #tpu.memory_space<vmem>>) attributes {dimension_semantics = [#tpu.dimension_semantics<parallel>, #tpu.dimension_semantics<parallel>, #tpu.dimension_semantics<parallel>, #tpu.dimension_semantics<arbitrary>], iteration_bounds = array<i64: 4, 1, 1, 1>, scalar_prefetch = 0 : i64, scratch_operands = 1 : i64, tpu.core_type = #tpu.core_type<tc>, window_params = [{transform_indices = @transform_0, window_bounds = array<i64: 1, 128, 512>}, {transform_indices = @transform_1, window_bounds = array<i64: 1, 512, 128>}, {transform_indices = @transform_2, window_bounds = array<i64: 1, 1, 128>}, {transform_indices = @transform_3, window_bounds = array<i64: 1, 128, 128>}]} {
    %c0_i32 = arith.constant 0 : i32
    %0 = arith.cmpi eq, %arg3, %c0_i32 : i32
    %1 = arith.extui %0 : i1 to i32
    %c0_i32_0 = arith.constant 0 : i32
    %2 = arith.cmpi ne, %1, %c0_i32_0 : i32
    scf.if %2 {
      %cst_12 = arith.constant 0.000000e+00 : f32
      %14 = vector.broadcast %cst_12 : f32 to vector<128x128xf32>
      %c0_13 = arith.constant 0 : index
      %c0_14 = arith.constant 0 : index
      %15 = vector.load %arg8[%c0_13, %c0_14] : memref<128x128xf32, #tpu.memory_space<vmem>>, vector<128x128xf32>
      tpu.vector_store %arg8[%c0_13, %c0_14], %14 {strides = array<i32>} : memref<128x128xf32, #tpu.memory_space<vmem>>, vector<128x128xf32>,
    } else {
    }
    %c0 = arith.constant 0 : index
    %c0_1 = arith.constant 0 : index
    %3 = vector.load %arg8[%c0, %c0_1] : memref<128x128xf32, #tpu.memory_space<vmem>>, vector<128x128xf32>
    %c0_2 = arith.constant 0 : index
    %c0_3 = arith.constant 0 : index
    %c0_4 = arith.constant 0 : index
    %4 = vector.load %arg4[%c0_2, %c0_3, %c0_4] : memref<1x128x512xbf16, #tpu.memory_space<vmem>>, vector<1x128x512xbf16>
    %5 = vector.shape_cast %4 : vector<1x128x512xbf16> to vector<128x512xbf16>
    %c0_5 = arith.constant 0 : index
    %c0_6 = arith.constant 0 : index
    %c0_7 = arith.constant 0 : index
    %6 = vector.load %arg5[%c0_5, %c0_6, %c0_7] : memref<1x512x128xbf16, #tpu.memory_space<vmem>>, vector<1x512x128xbf16>
    %7 = vector.shape_cast %6 : vector<1x512x128xbf16> to vector<512x128xbf16>
    %cst = arith.constant dense<0.000000e+00> : vector<128x128xf32>
    %8 = tpu.matmul %5, %7, %cst {dimension_numbers = #tpu.dot_dimension_numbers<[1], [0], [0], [1], [0, 0, 1, 1], [], []>} : vector<128x512xbf16>, vector<512x128xbf16>, vector<128x128xf32> -> vector<128x128xf32>
    %9 = arith.addf %3, %8 : vector<128x128xf32>
    %c0_8 = arith.constant 0 : index
    %c0_9 = arith.constant 0 : index
    %10 = vector.load %arg8[%c0_8, %c0_9] : memref<128x128xf32, #tpu.memory_space<vmem>>, vector<128x128xf32>
    tpu.vector_store %arg8[%c0_8, %c0_9], %9 {strides = array<i32>} : memref<128x128xf32, #tpu.memory_space<vmem>>, vector<128x128xf32>,
    %c0_i32_10 = arith.constant 0 : i32
    %11 = arith.cmpi eq, %arg3, %c0_i32_10 : i32
    %12 = arith.extui %11 : i1 to i32
    %c0_i32_11 = arith.constant 0 : i32
    %13 = arith.cmpi ne, %12, %c0_i32_11 : i32
    scf.if %13 {
      %c0_12 = arith.constant 0 : index
      %c0_13 = arith.constant 0 : index
      %14 = vector.load %arg8[%c0_12, %c0_13] : memref<128x128xf32, #tpu.memory_space<vmem>>, vector<128x128xf32>
      %c0_14 = arith.constant 0 : index
      %c0_15 = arith.constant 0 : index
      %c0_16 = arith.constant 0 : index
      %15 = vector.load %arg6[%c0_14, %c0_15, %c0_16] : memref<1x1x128xf32, #tpu.memory_space<vmem>>, vector<1x1x128xf32>
      %16 = vector.shape_cast %15 : vector<1x1x128xf32> to vector<1x128xf32>
      %17 = vector.broadcast %16 : vector<1x128xf32> to vector<128x128xf32>
      %18 = arith.addf %14, %17 : vector<128x128xf32>
      %cst_17 = arith.constant 0.000000e+00 : f32
      %19 = vector.broadcast %cst_17 : f32 to vector<128x128xf32>
      %20 = arith.maximumf %18, %19 : vector<128x128xf32>
      %c0_18 = arith.constant 0 : index
      %c0_19 = arith.constant 0 : index
      %c0_20 = arith.constant 0 : index
      %21 = vector.load %arg7[%c0_18, %c0_19, %c0_20] : memref<1x128x128xf32, #tpu.memory_space<vmem>>, vector<1x128x128xf32>
      %22 = vector.shape_cast %21 : vector<1x128x128xf32> to vector<128x128xf32>
      %23 = vector.shape_cast %20 : vector<128x128xf32> to vector<1x128x128xf32>
      tpu.vector_store %arg7[%c0_18, %c0_19, %c0_20], %23 {strides = array<i32>} : memref<1x128x128xf32, #tpu.memory_space<vmem>>, vector<1x128x128xf32>,
    } else {
    }
    return
  }
  func.func @transform_0(%arg0: i32, %arg1: i32, %arg2: i32, %arg3: i32) -> (i32, i32, i32) {
    %c0_i32 = arith.constant 0 : i32
    return %arg0, %arg1, %arg3 : i32, i32, i32
  }
  func.func @transform_1(%arg0: i32, %arg1: i32, %arg2: i32, %arg3: i32) -> (i32, i32, i32) {
    %c0_i32 = arith.constant 0 : i32
    return %arg0, %arg3, %arg2 : i32, i32, i32
  }
  func.func @transform_2(%arg0: i32, %arg1: i32, %arg2: i32, %arg3: i32) -> (i32, i32, i32) {
    %c0_i32 = arith.constant 0 : i32
    %c0_i32_0 = arith.constant 0 : i32
    return %arg0, %c0_i32, %arg2 : i32, i32, i32
  }
  func.func @transform_3(%arg0: i32, %arg1: i32, %arg2: i32, %arg3: i32) -> (i32, i32, i32) {
    %c0_i32 = arith.constant 0 : i32
    return %arg0, %arg1, %arg2 : i32, i32, i32
  }
}

module attributes {stable_mosaic.version = 11 : i64} {
  func.func @_upsample_concat_kernel(%arg0: i32, %arg1: i32, %arg2: memref<1x256x512xf32, #tpu.memory_space<vmem>>, %arg3: memref<4x256x64xf32, #tpu.memory_space<vmem>>, %arg4: memref<4x1x64x128xf32, #tpu.memory_space<vmem>>, %arg5: memref<1x256x1024xf32, #tpu.memory_space<vmem>>) attributes {dimension_semantics = [#tpu.dimension_semantics<parallel>, #tpu.dimension_semantics<parallel>], iteration_bounds = array<i64: 2, 1>, scalar_prefetch = 0 : i64, scratch_operands = 0 : i64, tpu.core_type = #tpu.core_type<tc>, window_params = [{transform_indices = @transform_0, window_bounds = array<i64: 1, 256, 512>}, {transform_indices = @transform_1, window_bounds = array<i64: 4, 256, 64>}, {transform_indices = @transform_2, window_bounds = array<i64: 4, 1, 64, 128>}, {transform_indices = @transform_3, window_bounds = array<i64: 1, 256, 1024>}]} {
    %c0 = arith.constant 0 : index
    %c0_0 = arith.constant 0 : index
    %c0_1 = arith.constant 0 : index
    %0 = vector.load %arg2[%c0, %c0_0, %c0_1] : memref<1x256x512xf32, #tpu.memory_space<vmem>>, vector<1x256x512xf32>
    %1 = vector.shape_cast %0 : vector<1x256x512xf32> to vector<256x512xf32>
    %c0_2 = arith.constant 0 : index
    %c0_3 = arith.constant 0 : index
    %c0_4 = arith.constant 0 : index
    %2 = vector.load %arg5[%c0_2, %c0_3, %c0_4] : memref<1x256x1024xf32, #tpu.memory_space<vmem>>, vector<1x256x512xf32>
    %3 = vector.shape_cast %2 : vector<1x256x512xf32> to vector<256x512xf32>
    %4 = vector.shape_cast %1 : vector<256x512xf32> to vector<1x256x512xf32>
    tpu.vector_store %arg5[%c0_2, %c0_3, %c0_4], %4 {strides = array<i32>} : memref<1x256x1024xf32, #tpu.memory_space<vmem>>, vector<1x256x512xf32>,
    %c0_5 = arith.constant 0 : index
    %c0_6 = arith.constant 0 : index
    %c0_7 = arith.constant 0 : index
    %5 = vector.load %arg3[%c0_5, %c0_6, %c0_7] : memref<4x256x64xf32, #tpu.memory_space<vmem>>, vector<1x256x64xf32>
    %6 = vector.shape_cast %5 : vector<1x256x64xf32> to vector<256x64xf32>
    %c0_8 = arith.constant 0 : index
    %c0_9 = arith.constant 0 : index
    %c0_10 = arith.constant 0 : index
    %c0_11 = arith.constant 0 : index
    %7 = vector.load %arg4[%c0_8, %c0_9, %c0_10, %c0_11] : memref<4x1x64x128xf32, #tpu.memory_space<vmem>>, vector<1x1x64x128xf32>
    %8 = vector.shape_cast %7 : vector<1x1x64x128xf32> to vector<64x128xf32>
    %cst = arith.constant dense<0.000000e+00> : vector<256x128xf32>
    %9 = tpu.matmul %6, %8, %cst {dimension_numbers = #tpu.dot_dimension_numbers<[1], [0], [0], [1], [0, 0, 1, 1], [], []>} : vector<256x64xf32>, vector<64x128xf32>, vector<256x128xf32> -> vector<256x128xf32>
    %c0_12 = arith.constant 0 : index
    %c0_13 = arith.constant 0 : index
    %c512 = arith.constant 512 : index
    %10 = vector.load %arg5[%c0_12, %c0_13, %c512] : memref<1x256x1024xf32, #tpu.memory_space<vmem>>, vector<1x256x128xf32>
    %11 = vector.shape_cast %10 : vector<1x256x128xf32> to vector<256x128xf32>
    %12 = vector.shape_cast %9 : vector<256x128xf32> to vector<1x256x128xf32>
    tpu.vector_store %arg5[%c0_12, %c0_13, %c512], %12 {strides = array<i32>} : memref<1x256x1024xf32, #tpu.memory_space<vmem>>, vector<1x256x128xf32>,
    %c1 = arith.constant 1 : index
    %c0_14 = arith.constant 0 : index
    %c0_15 = arith.constant 0 : index
    %13 = vector.load %arg3[%c1, %c0_14, %c0_15] : memref<4x256x64xf32, #tpu.memory_space<vmem>>, vector<1x256x64xf32>
    %14 = vector.shape_cast %13 : vector<1x256x64xf32> to vector<256x64xf32>
    %c1_16 = arith.constant 1 : index
    %c0_17 = arith.constant 0 : index
    %c0_18 = arith.constant 0 : index
    %c0_19 = arith.constant 0 : index
    %15 = vector.load %arg4[%c1_16, %c0_17, %c0_18, %c0_19] : memref<4x1x64x128xf32, #tpu.memory_space<vmem>>, vector<1x1x64x128xf32>
    %16 = vector.shape_cast %15 : vector<1x1x64x128xf32> to vector<64x128xf32>
    %cst_20 = arith.constant dense<0.000000e+00> : vector<256x128xf32>
    %17 = tpu.matmul %14, %16, %cst_20 {dimension_numbers = #tpu.dot_dimension_numbers<[1], [0], [0], [1], [0, 0, 1, 1], [], []>} : vector<256x64xf32>, vector<64x128xf32>, vector<256x128xf32> -> vector<256x128xf32>
    %c0_21 = arith.constant 0 : index
    %c0_22 = arith.constant 0 : index
    %c640 = arith.constant 640 : index
    %18 = vector.load %arg5[%c0_21, %c0_22, %c640] : memref<1x256x1024xf32, #tpu.memory_space<vmem>>, vector<1x256x128xf32>
    %19 = vector.shape_cast %18 : vector<1x256x128xf32> to vector<256x128xf32>
    %20 = vector.shape_cast %17 : vector<256x128xf32> to vector<1x256x128xf32>
    tpu.vector_store %arg5[%c0_21, %c0_22, %c640], %20 {strides = array<i32>} : memref<1x256x1024xf32, #tpu.memory_space<vmem>>, vector<1x256x128xf32>,
    %c2 = arith.constant 2 : index
    %c0_23 = arith.constant 0 : index
    %c0_24 = arith.constant 0 : index
    %21 = vector.load %arg3[%c2, %c0_23, %c0_24] : memref<4x256x64xf32, #tpu.memory_space<vmem>>, vector<1x256x64xf32>
    %22 = vector.shape_cast %21 : vector<1x256x64xf32> to vector<256x64xf32>
    %c2_25 = arith.constant 2 : index
    %c0_26 = arith.constant 0 : index
    %c0_27 = arith.constant 0 : index
    %c0_28 = arith.constant 0 : index
    %23 = vector.load %arg4[%c2_25, %c0_26, %c0_27, %c0_28] : memref<4x1x64x128xf32, #tpu.memory_space<vmem>>, vector<1x1x64x128xf32>
    %24 = vector.shape_cast %23 : vector<1x1x64x128xf32> to vector<64x128xf32>
    %cst_29 = arith.constant dense<0.000000e+00> : vector<256x128xf32>
    %25 = tpu.matmul %22, %24, %cst_29 {dimension_numbers = #tpu.dot_dimension_numbers<[1], [0], [0], [1], [0, 0, 1, 1], [], []>} : vector<256x64xf32>, vector<64x128xf32>, vector<256x128xf32> -> vector<256x128xf32>
    %c0_30 = arith.constant 0 : index
    %c0_31 = arith.constant 0 : index
    %c768 = arith.constant 768 : index
    %26 = vector.load %arg5[%c0_30, %c0_31, %c768] : memref<1x256x1024xf32, #tpu.memory_space<vmem>>, vector<1x256x128xf32>
    %27 = vector.shape_cast %26 : vector<1x256x128xf32> to vector<256x128xf32>
    %28 = vector.shape_cast %25 : vector<256x128xf32> to vector<1x256x128xf32>
    tpu.vector_store %arg5[%c0_30, %c0_31, %c768], %28 {strides = array<i32>} : memref<1x256x1024xf32, #tpu.memory_space<vmem>>, vector<1x256x128xf32>,
    %c3 = arith.constant 3 : index
    %c0_32 = arith.constant 0 : index
    %c0_33 = arith.constant 0 : index
    %29 = vector.load %arg3[%c3, %c0_32, %c0_33] : memref<4x256x64xf32, #tpu.memory_space<vmem>>, vector<1x256x64xf32>
    %30 = vector.shape_cast %29 : vector<1x256x64xf32> to vector<256x64xf32>
    %c3_34 = arith.constant 3 : index
    %c0_35 = arith.constant 0 : index
    %c0_36 = arith.constant 0 : index
    %c0_37 = arith.constant 0 : index
    %31 = vector.load %arg4[%c3_34, %c0_35, %c0_36, %c0_37] : memref<4x1x64x128xf32, #tpu.memory_space<vmem>>, vector<1x1x64x128xf32>
    %32 = vector.shape_cast %31 : vector<1x1x64x128xf32> to vector<64x128xf32>
    %cst_38 = arith.constant dense<0.000000e+00> : vector<256x128xf32>
    %33 = tpu.matmul %30, %32, %cst_38 {dimension_numbers = #tpu.dot_dimension_numbers<[1], [0], [0], [1], [0, 0, 1, 1], [], []>} : vector<256x64xf32>, vector<64x128xf32>, vector<256x128xf32> -> vector<256x128xf32>
    %c0_39 = arith.constant 0 : index
    %c0_40 = arith.constant 0 : index
    %c896 = arith.constant 896 : index
    %34 = vector.load %arg5[%c0_39, %c0_40, %c896] : memref<1x256x1024xf32, #tpu.memory_space<vmem>>, vector<1x256x128xf32>
    %35 = vector.shape_cast %34 : vector<1x256x128xf32> to vector<256x128xf32>
    %36 = vector.shape_cast %33 : vector<256x128xf32> to vector<1x256x128xf32>
    tpu.vector_store %arg5[%c0_39, %c0_40, %c896], %36 {strides = array<i32>} : memref<1x256x1024xf32, #tpu.memory_space<vmem>>, vector<1x256x128xf32>,
    return
  }
  func.func @transform_0(%arg0: i32, %arg1: i32) -> (i32, i32, i32) {
    %c0_i32 = arith.constant 0 : i32
    %c0_i32_0 = arith.constant 0 : i32
    return %arg0, %arg1, %c0_i32 : i32, i32, i32
  }
  func.func @transform_1(%arg0: i32, %arg1: i32) -> (i32, i32, i32) {
    %c0_i32 = arith.constant 0 : i32
    %c0_i32_0 = arith.constant 0 : i32
    %c0_i32_1 = arith.constant 0 : i32
    return %c0_i32, %arg1, %c0_i32_0 : i32, i32, i32
  }
  func.func @transform_2(%arg0: i32, %arg1: i32) -> (i32, i32, i32, i32) {
    %c0_i32 = arith.constant 0 : i32
    %c0_i32_0 = arith.constant 0 : i32
    %c0_i32_1 = arith.constant 0 : i32
    %c0_i32_2 = arith.constant 0 : i32
    return %c0_i32, %arg0, %c0_i32_0, %c0_i32_1 : i32, i32, i32, i32
  }
  func.func @transform_3(%arg0: i32, %arg1: i32) -> (i32, i32, i32) {
    %c0_i32 = arith.constant 0 : i32
    %c0_i32_0 = arith.constant 0 : i32
    return %arg0, %arg1, %c0_i32 : i32, i32, i32
  }
}

</mosaic_0001>

<bundles_post_ra>
// kernel: ppm_forward.2
= control target key start
LH: loop header
LB: loop body
LE: loop exit
PB: predicated region body
PF: predicated region fallthrough
CT: control target
= control target key end

     0   :  { %s1607_s12 = smov 0   ;;  %s1609_s13 = smov 0   ;;  %s1759_s0 = inlined_call_operand.vmem [shape: bf16[4,128,512], index: 0, kind: input, shape index: {}]   ;;  %s1760_s1 = inlined_call_operand.vmem [shape: bf16[4,512,128], index: 1, kind: input, shape index: {}]   ;;  %s1761_s2 = inlined_call_operand.vmem [shape: f32[4,1,128], index: 2, kind: input, shape index: {}]   ;;  %s1762_s3 = inlined_call_operand.vmem [shape: f32[4,128,128], index: 3, kind: output, shape index: {}]  }
   0x1   :  { %s1611_s14 = smov 0  }
   0x2 LB: > { %s39_s15 = sadd.s32 1, %s1581_s13  ;;  %p1254_p0 = scmp.ge.s32.totalorder %s1585_s14, 1  ;;  %s1585_s14 = sphi %s1611_s14, %s13_s14   ;;  %s1581_s13 = sphi %s1609_s13, %s1764_s13   ;;  %s1577_s12 = sphi %s1607_s12, %s1763_s12  }
   0x3   : > { %p41_p1 = scmp.ge.s32.totalorder %s39_s15, 4  ;;  %p217_p2 = scmp.lt.s32.totalorder %s1585_s14, 5 }
   0x5   : > { %s1766_s15 = smov (%p41_p1, %s39_s15), 0  ;;  %p218_p3 = pnand %p1254_p0, %p217_p2 }
   0x6   : > { %p277_p4 = scmp.lt.s32.totalorder (!%p218_p3), %s1577_s12, 3 }
   0x7   : > { %221 = sbr.rel (%p218_p3) target bundleno = 332 (0x14c), region = 32 }
   0xe   : > { %s1768_s12 = smov (!%p277_p4, %s1577_s12), 3 }
   0xf   : > { %s1328_s16 = sshll.u32 %s1768_s12, 8  ;;  %s309_s25 = scalar_lea.vmem %s1761_s2, %s1768_s12 }
  0x10   : > { %s1633_s19 = scalar_lea.vmem %s1760_s1, %s1328_s16  ;;  %s1670_s22 = scalar_lea.vmem %s1759_s0, %s1328_s16 }
  0x11   : > { %v1483_v0 = vld [vmem:[%s1633_s19 + $0x40] sm:$0xff]   ;;  %v1487_v4 = vld [vmem:[%s1633_s19 + $0x48] sm:$0xff]   ;;  %v1491_v8 = vld [vmem:[%s1633_s19 + $0x50] sm:$0xff]   ;;  %s1330_s26 = sshll.u32 %s1768_s12, 7 }
  0x12   : > { %v1484_v1 = vld [vmem:[%s1633_s19 + $0xc0] sm:$0xff]   ;;  %1331 = vmatprep.subr.bf16.mxu0 %v1483_v0  ;;  %v1488_v5 = vld [vmem:[%s1633_s19 + $0xc8] sm:$0xff]   ;;  %v1492_v9 = vld [vmem:[%s1633_s19 + $0xd0] sm:$0xff]   ;;  %s1717_s29 = scalar_lea.vmem %s1762_s3, %s1330_s26 }
  0x13   : > { %v1485_v2 = vld [vmem:[%s1633_s19] sm:$0xff]   ;;  %1395 = vmatprep.subr.bf16.mxu1 %v1484_v1  ;;  %v1489_v6 = vld [vmem:[%s1633_s19 + $0x8] sm:$0xff]   ;;  %v1493_v10 = vld [vmem:[%s1633_s19 + $0x10] sm:$0xff]  }
  0x14   : > { %v1486_v3 = vld [vmem:[%s1633_s19 + $0x80] sm:$0xff]   ;;  %1332 = vmatpush3.bf16.msra.mxu0 %v1485_v2  ;;  %v1490_v7 = vld [vmem:[%s1633_s19 + $0x88] sm:$0xff]   ;;  %v1494_v11 = vld [vmem:[%s1633_s19 + $0x90] sm:$0xff]  }
  0x15   : > { %1396 = vmatpush3.bf16.msra.mxu1 %v1486_v3  ;;  %1333 = vmatprep.subr.bf16.mxu0 %v1487_v4  ;;  %v1495_v12 = vld [vmem:[%s1633_s19 + $0x58] sm:$0xff]   ;;  %v1499_v16 = vld [vmem:[%s1633_s19 + $0x60] sm:$0xff]   ;;  %v1503_v20 = vld [vmem:[%s1633_s19 + $0x68] sm:$0xff]  }
  0x16   : > { %1397 = vmatprep.subr.bf16.mxu1 %v1488_v5  ;;  %v1496_v13 = vld [vmem:[%s1633_s19 + $0xd8] sm:$0xff]   ;;  %v1500_v17 = vld [vmem:[%s1633_s19 + $0xe0] sm:$0xff]   ;;  %v1504_v21 = vld [vmem:[%s1633_s19 + $0xe8] sm:$0xff]  }
  0x17   : > { %v1497_v14 = vld [vmem:[%s1633_s19 + $0x18] sm:$0xff]   ;;  %v1501_v18 = vld [vmem:[%s1633_s19 + $0x20] sm:$0xff]   ;;  %v1505_v22 = vld [vmem:[%s1633_s19 + $0x28] sm:$0xff]  }
  0x18   : > { %1334 = vmatpush3.bf16.msra.mxu0 %v1489_v6  ;;  %v1498_v15 = vld [vmem:[%s1633_s19 + $0x98] sm:$0xff]   ;;  %v1502_v19 = vld [vmem:[%s1633_s19 + $0xa0] sm:$0xff]   ;;  %v1506_v23 = vld [vmem:[%s1633_s19 + $0xa8] sm:$0xff]  }
  0x19   : > { %1398 = vmatpush3.bf16.msra.mxu1 %v1490_v7  ;;  %1335 = vmatprep.subr.bf16.mxu0 %v1491_v8  ;;  %v1507_v24 = vld [vmem:[%s1633_s19 + $0x70] sm:$0xff]   ;;  %v1511_v28 = vld [vmem:[%s1633_s19 + $0x78] sm:$0xff]  }
  0x1a   : > { %1399 = vmatprep.subr.bf16.mxu1 %v1492_v9  ;;  %v1508_v25 = vld [vmem:[%s1633_s19 + $0xf0] sm:$0xff]   ;;  %v1512_v29 = vld [vmem:[%s1633_s19 + $0xf8] sm:$0xff]   ;;  %v1710_v9 = vld [vmem:[%s309_s25] ss:$0 sm:$0xff] }
  0x1b   : > { %v1509_v26 = vld [vmem:[%s1633_s19 + $0x30] sm:$0xff]   ;;  %v1513_v30 = vld [vmem:[%s1633_s19 + $0x38] sm:$0xff]  }
  0x1c   : > { %1336 = vmatpush3.bf16.msra.mxu0 %v1493_v10  ;;  %v1510_v27 = vld [vmem:[%s1633_s19 + $0xb0] sm:$0xff]   ;;  %v1514_v31 = vld [vmem:[%s1633_s19 + $0xb8] sm:$0xff]  }
  0x1d   : > { %1400 = vmatpush3.bf16.msra.mxu1 %v1494_v11  ;;  %1337 = vmatprep.subr.bf16.mxu0 %v1495_v12  ;;  %v1515_v32 = vld [vmem:[%s1670_s22] ss:$16 sps:$4 sm:$0xff]   ;;  %v1517_v33 = vld [vmem:[%s1670_s22 + $0x4] ss:$16 sps:$4 sm:$0xff]   ;;  %v1518_v34 = vld [vmem:[%s1670_s22 + $0x8] ss:$16 sps:$4 sm:$0xff]  }
  0x1e   : > { %1401 = vmatprep.subr.bf16.mxu1 %v1496_v13  ;;  %v1520_v35 = vld [vmem:[%s1670_s22 + $0xc] ss:$16 sps:$4 sm:$0xff]   ;;  %840 = vmatprep.mubr.bf16.mxu0 %v1517_v33  ;;  %v1521_v36 = vld [vmem:[%s1670_s22 + $0x24] ss:$16 sps:$4 sm:$0xff]   ;;  %v1525_v38 = vld [vmem:[%s1670_s22 + $0x20] ss:$16 sps:$4 sm:$0xff]  }
  0x1f   : > { %937 = vmatprep.mubr.bf16.mxu1 %v1520_v35  ;;  %v1523_v37 = vld [vmem:[%s1670_s22 + $0x2c] ss:$16 sps:$4 sm:$0xff]   ;;  %v1526_v39 = vld [vmem:[%s1670_s22 + $0x28] ss:$16 sps:$4 sm:$0xff]   ;;  %v1527_v40 = vld [vmem:[%s1670_s22 + $0x44] ss:$16 sps:$4 sm:$0xff]  }
  0x20   : > { %1338 = vmatpush3.bf16.msra.mxu0 %v1497_v14  ;;  %v1529_v41 = vld [vmem:[%s1670_s22 + $0x4c] ss:$16 sps:$4 sm:$0xff]   ;;  %v1531_v42 = vld [vmem:[%s1670_s22 + $0x40] ss:$16 sps:$4 sm:$0xff]   ;;  %v1532_v43 = vld [vmem:[%s1670_s22 + $0x48] ss:$16 sps:$4 sm:$0xff]  }
  0x21   : > { %1402 = vmatpush3.bf16.msra.mxu1 %v1498_v15  ;;  %1339 = vmatprep.subr.bf16.mxu0 %v1499_v16  ;;  %v1533_v44 = vld [vmem:[%s1670_s22 + $0x64] ss:$16 sps:$4 sm:$0xff]   ;;  %v1535_v45 = vld [vmem:[%s1670_s22 + $0x6c] ss:$16 sps:$4 sm:$0xff]   ;;  %v1537_v46 = vld [vmem:[%s1670_s22 + $0x60] ss:$16 sps:$4 sm:$0xff]  }
  0x22   : > { %1403 = vmatprep.subr.bf16.mxu1 %v1500_v17  ;;  %v1538_v47 = vld [vmem:[%s1670_s22 + $0x68] ss:$16 sps:$4 sm:$0xff]   ;;  %v1539_v48 = vld [vmem:[%s1670_s22 + $0x84] ss:$16 sps:$4 sm:$0xff]   ;;  %v1541_v49 = vld [vmem:[%s1670_s22 + $0x8c] ss:$16 sps:$4 sm:$0xff]  }
  0x23   : > { %v1543_v50 = vld [vmem:[%s1670_s22 + $0x80] ss:$16 sps:$4 sm:$0xff]   ;;  %v1544_v51 = vld [vmem:[%s1670_s22 + $0x88] ss:$16 sps:$4 sm:$0xff]   ;;  %v1545_v52 = vld [vmem:[%s1670_s22 + $0xa4] ss:$16 sps:$4 sm:$0xff]  }
  0x24   : > { %1340 = vmatpush3.bf16.msra.mxu0 %v1501_v18  ;;  %v1547_v53 = vld [vmem:[%s1670_s22 + $0xac] ss:$16 sps:$4 sm:$0xff]   ;;  %v1549_v54 = vld [vmem:[%s1670_s22 + $0xa0] ss:$16 sps:$4 sm:$0xff]   ;;  %v1550_v55 = vld [vmem:[%s1670_s22 + $0xa8] ss:$16 sps:$4 sm:$0xff]  }
  0x25   : > { %1404 = vmatpush3.bf16.msra.mxu1 %v1502_v19  ;;  %1341 = vmatprep.subr.bf16.mxu0 %v1503_v20  ;;  %v1551_v56 = vld [vmem:[%s1670_s22 + $0xc4] ss:$16 sps:$4 sm:$0xff]   ;;  %v1553_v57 = vld [vmem:[%s1670_s22 + $0xcc] ss:$16 sps:$4 sm:$0xff]   ;;  %v1555_v58 = vld [vmem:[%s1670_s22 + $0xc0] ss:$16 sps:$4 sm:$0xff]  }
  0x26   : > { %1405 = vmatprep.subr.bf16.mxu1 %v1504_v21  ;;  %v1556_v59 = vld [vmem:[%s1670_s22 + $0xc8] ss:$16 sps:$4 sm:$0xff]   ;;  %v1557_v60 = vld [vmem:[%s1670_s22 + $0xe4] ss:$16 sps:$4 sm:$0xff]   ;;  %v1559_v61 = vld [vmem:[%s1670_s22 + $0xec] ss:$16 sps:$4 sm:$0xff]  }
  0x27   : > { %v1561_v62 = vld [vmem:[%s1670_s22 + $0xe0] ss:$16 sps:$4 sm:$0xff]   ;;  %v1562_v63 = vld [vmem:[%s1670_s22 + $0xe8] ss:$16 sps:$4 sm:$0xff]  }
  0x28   : > { %1342 = vmatpush3.bf16.msra.mxu0 %v1505_v22 }
  0x29   : > { %1406 = vmatpush3.bf16.msra.mxu1 %v1506_v23  ;;  %1343 = vmatprep.subr.bf16.mxu0 %v1507_v24 }
  0x2a   : > { %1407 = vmatprep.subr.bf16.mxu1 %v1508_v25 }
  0x2c   : > { %1344 = vmatpush3.bf16.msra.mxu0 %v1509_v26 }
  0x2d   : > { %1408 = vmatpush3.bf16.msra.mxu1 %v1510_v27  ;;  %1345 = vmatprep.subr.bf16.mxu0 %v1511_v28 }
  0x2e   : > { %1409 = vmatprep.subr.bf16.mxu1 %v1512_v29 }
  0x30   : > { %1346 = vmatpush3.bf16.msra.mxu0 %v1513_v30 }
  0x31   : > { %1410 = vmatpush3.bf16.msra.mxu1 %v1514_v31 }
  0x33   : > { %841 = vmatmul.mubr.bf16.vlgmr.msra.gmra.mrb[0].mxu0 %v1515_v32 }
  0x34   : > { %938 = vmatmul.mubr.bf16.vlgmr.msra.gmra.mrb[0].mxu1 %v1518_v34  ;;  %848 = vmatprep.mubr.bf16.mxu0 %v1521_v36 }
  0x35   : > { %945 = vmatprep.mubr.bf16.mxu1 %v1523_v37 }
  0x3b   : > { %849 = vmatmul.mubr.bf16.gmra.mrb[4].mxu0 %v1525_v38 }
  0x3c   : > { %946 = vmatmul.mubr.bf16.gmra.mrb[4].mxu1 %v1526_v39  ;;  %856 = vmatprep.mubr.bf16.mxu0 %v1527_v40 }
  0x3d   : > { %953 = vmatprep.mubr.bf16.mxu1 %v1529_v41 }
  0x43   : > { %857 = vmatmul.mubr.bf16.gmra.mrb[8].mxu0 %v1531_v42 }
  0x44   : > { %954 = vmatmul.mubr.bf16.gmra.mrb[8].mxu1 %v1532_v43  ;;  %864 = vmatprep.mubr.bf16.mxu0 %v1533_v44 }
  0x45   : > { %961 = vmatprep.mubr.bf16.mxu1 %v1535_v45 }
  0x4b   : > { %865 = vmatmul.mubr.bf16.gmra.mrb[12].mxu0 %v1537_v46 }
  0x4c   : > { %962 = vmatmul.mubr.bf16.gmra.mrb[12].mxu1 %v1538_v47  ;;  %872 = vmatprep.mubr.bf16.mxu0 %v1539_v48 }
  0x4d   : > { %969 = vmatprep.mubr.bf16.mxu1 %v1541_v49 }
  0x53   : > { %873 = vmatmul.mubr.bf16.gmra.mrb[16].mxu0 %v1543_v50 }
  0x54   : > { %970 = vmatmul.mubr.bf16.gmra.mrb[16].mxu1 %v1544_v51  ;;  %880 = vmatprep.mubr.bf16.mxu0 %v1545_v52 }
  0x55   : > { %977 = vmatprep.mubr.bf16.mxu1 %v1547_v53 }
  0x5b   : > { %881 = vmatmul.mubr.bf16.gmra.mrb[20].mxu0 %v1549_v54 }
  0x5c   : > { %978 = vmatmul.mubr.bf16.gmra.mrb[20].mxu1 %v1550_v55  ;;  %888 = vmatprep.mubr.bf16.mxu0 %v1551_v56 }
  0x5d   : > { %985 = vmatprep.mubr.bf16.mxu1 %v1553_v57 }
  0x63   : > { %889 = vmatmul.mubr.bf16.gmra.mrb[24].mxu0 %v1555_v58 }
  0x64   : > { %986 = vmatmul.mubr.bf16.gmra.mrb[24].mxu1 %v1556_v59  ;;  %896 = vmatprep.mubr.bf16.mxu0 %v1557_v60 }
  0x65   : > { %993 = vmatprep.mubr.bf16.mxu1 %v1559_v61 }
  0x6b   : > { %897 = vmatmul.mubr.bf16.gmra.mrb[28].mxu0 %v1561_v62 }
  0x6c   : > { %994 = vmatmul.mubr.bf16.gmra.mrb[28].mxu1 %v1562_v63 }
 0x106   : > { %v1347_v0 = vpop.f32.mrb[0].mxu0 }
 0x107   : > { %v1411_v1 = vpop.f32.mrb[0].mxu1  ;;  %v1348_v2 = vpop.f32.mrb[1].mxu0 }
 0x108   : > { %v1349_v3 = vadd.f32 %v1348_v2, %v1347_v0  ;;  %v1412_v4 = vpop.f32.mrb[1].mxu1  ;;  %v1350_v5 = vpop.f32.mrb[2].mxu0 }
 0x109   : > { %v1413_v6 = vadd.f32 %v1412_v4, %v1411_v1  ;;  %v1414_v7 = vpop.f32.mrb[2].mxu1  ;;  %v1351_v8 = vpop.f32.mrb[3].mxu0 }
 0x10a   : > { %v1352_v10 = vadd.f32 %v1351_v8, %v1350_v5  ;;  %v1415_v11 = vpop.f32.mrb[3].mxu1 }
 0x10b   : > { %v940_v12 = vadd.f32 %v1413_v6, %v1349_v3  ;;  %v1416_v13 = vadd.f32 %v1415_v11, %v1414_v7 }
 0x10d   : > { %v1060_v14 = vadd.f32 %v1710_v9, %v940_v12  ;;  %v943_v15 = vadd.f32 %v1416_v13, %v1352_v10 }
 0x10e   : > { %v1353_v16 = vpop.f32.mrb[4].mxu0 }
 0x10f   : > { %v1076_v17 = vmax.f32 %v1060_v14, 0.0  ;;  %v1061_v18 = vadd.f32 %v1710_v9, %v943_v15  ;;  %v1417_v19 = vpop.f32.mrb[4].mxu1  ;;  %v1354_v20 = vpop.f32.mrb[5].mxu0 }
 0x110   : > { %v1355_v21 = vadd.f32 %v1354_v20, %v1353_v16  ;;  %v1418_v22 = vpop.f32.mrb[5].mxu1  ;;  %v1356_v23 = vpop.f32.mrb[6].mxu0 }
 0x111   : > { %1092 = vst [vmem:[%s1717_s29] sm:$0xff] %v1076_v17  ;;  %v1077_v24 = vmax.f32 %v1061_v18, 0.0  ;;  %v1419_v25 = vadd.f32 %v1418_v22, %v1417_v19  ;;  %v1420_v26 = vpop.f32.mrb[6].mxu1  ;;  %v1357_v27 = vpop.f32.mrb[7].mxu0 }
 0x112   : > { %v1358_v28 = vadd.f32 %v1357_v27, %v1356_v23  ;;  %v1421_v29 = vpop.f32.mrb[7].mxu1 }
 0x113   : > { %1093 = vst [vmem:[%s1717_s29 + $0x8] sm:$0xff] %v1077_v24  ;;  %v948_v30 = vadd.f32 %v1419_v25, %v1355_v21  ;;  %v1422_v31 = vadd.f32 %v1421_v29, %v1420_v26 }
 0x115   : > { %v1062_v32 = vadd.f32 %v1710_v9, %v948_v30  ;;  %v951_v33 = vadd.f32 %v1422_v31, %v1358_v28 }
 0x116   : > { %v1359_v34 = vpop.f32.mrb[8].mxu0 }
 0x117   : > { %v1078_v35 = vmax.f32 %v1062_v32, 0.0  ;;  %v1063_v36 = vadd.f32 %v1710_v9, %v951_v33  ;;  %v1423_v37 = vpop.f32.mrb[8].mxu1  ;;  %v1360_v38 = vpop.f32.mrb[9].mxu0 }
 0x118   : > { %v1361_v39 = vadd.f32 %v1360_v38, %v1359_v34  ;;  %v1424_v40 = vpop.f32.mrb[9].mxu1  ;;  %v1362_v41 = vpop.f32.mrb[10].mxu0 }
 0x119   : > { %1094 = vst [vmem:[%s1717_s29 + $0x10] sm:$0xff] %v1078_v35  ;;  %v1079_v42 = vmax.f32 %v1063_v36, 0.0  ;;  %v1425_v43 = vadd.f32 %v1424_v40, %v1423_v37  ;;  %v1426_v44 = vpop.f32.mrb[10].mxu1  ;;  %v1363_v45 = vpop.f32.mrb[11].mxu0 }
 0x11a   : > { %v1364_v46 = vadd.f32 %v1363_v45, %v1362_v41  ;;  %v1427_v47 = vpop.f32.mrb[11].mxu1 }
 0x11b   : > { %1095 = vst [vmem:[%s1717_s29 + $0x18] sm:$0xff] %v1079_v42  ;;  %v956_v48 = vadd.f32 %v1425_v43, %v1361_v39  ;;  %v1428_v49 = vadd.f32 %v1427_v47, %v1426_v44 }
 0x11d   : > { %v1064_v50 = vadd.f32 %v1710_v9, %v956_v48  ;;  %v959_v51 = vadd.f32 %v1428_v49, %v1364_v46 }
 0x11e   : > { %v1365_v52 = vpop.f32.mrb[12].mxu0 }
 0x11f   : > { %v1080_v53 = vmax.f32 %v1064_v50, 0.0  ;;  %v1065_v54 = vadd.f32 %v1710_v9, %v959_v51  ;;  %v1429_v55 = vpop.f32.mrb[12].mxu1  ;;  %v1366_v56 = vpop.f32.mrb[13].mxu0 }
 0x120   : > { %v1367_v57 = vadd.f32 %v1366_v56, %v1365_v52  ;;  %v1430_v58 = vpop.f32.mrb[13].mxu1  ;;  %v1368_v59 = vpop.f32.mrb[14].mxu0 }
 0x121   : > { %1096 = vst [vmem:[%s1717_s29 + $0x20] sm:$0xff] %v1080_v53  ;;  %v1081_v60 = vmax.f32 %v1065_v54, 0.0  ;;  %v1431_v61 = vadd.f32 %v1430_v58, %v1429_v55  ;;  %v1432_v62 = vpop.f32.mrb[14].mxu1  ;;  %v1369_v63 = vpop.f32.mrb[15].mxu0 }
 0x122   : > { %v1370_v0 = vadd.f32 %v1369_v63, %v1368_v59  ;;  %v1433_v1 = vpop.f32.mrb[15].mxu1 }
 0x123   : > { %1097 = vst [vmem:[%s1717_s29 + $0x28] sm:$0xff] %v1081_v60  ;;  %v964_v2 = vadd.f32 %v1431_v61, %v1367_v57  ;;  %v1434_v3 = vadd.f32 %v1433_v1, %v1432_v62 }
 0x125   : > { %v1066_v4 = vadd.f32 %v1710_v9, %v964_v2  ;;  %v967_v5 = vadd.f32 %v1434_v3, %v1370_v0 }
 0x126   : > { %v1371_v6 = vpop.f32.mrb[16].mxu0 }
 0x127   : > { %v1082_v7 = vmax.f32 %v1066_v4, 0.0  ;;  %v1067_v8 = vadd.f32 %v1710_v9, %v967_v5  ;;  %v1435_v10 = vpop.f32.mrb[16].mxu1  ;;  %v1372_v11 = vpop.f32.mrb[17].mxu0 }
 0x128   : > { %v1373_v12 = vadd.f32 %v1372_v11, %v1371_v6  ;;  %v1436_v13 = vpop.f32.mrb[17].mxu1  ;;  %v1374_v14 = vpop.f32.mrb[18].mxu0 }
 0x129   : > { %1098 = vst [vmem:[%s1717_s29 + $0x30] sm:$0xff] %v1082_v7  ;;  %v1083_v15 = vmax.f32 %v1067_v8, 0.0  ;;  %v1437_v16 = vadd.f32 %v1436_v13, %v1435_v10  ;;  %v1438_v17 = vpop.f32.mrb[18].mxu1  ;;  %v1375_v18 = vpop.f32.mrb[19].mxu0 }
 0x12a   : > { %v1376_v19 = vadd.f32 %v1375_v18, %v1374_v14  ;;  %v1439_v20 = vpop.f32.mrb[19].mxu1 }
 0x12b   : > { %1099 = vst [vmem:[%s1717_s29 + $0x38] sm:$0xff] %v1083_v15  ;;  %v972_v21 = vadd.f32 %v1437_v16, %v1373_v12  ;;  %v1440_v22 = vadd.f32 %v1439_v20, %v1438_v17 }
 0x12d   : > { %v1068_v23 = vadd.f32 %v1710_v9, %v972_v21  ;;  %v975_v24 = vadd.f32 %v1440_v22, %v1376_v19 }
 0x12e   : > { %v1377_v25 = vpop.f32.mrb[20].mxu0 }
 0x12f   : > { %v1084_v26 = vmax.f32 %v1068_v23, 0.0  ;;  %v1069_v27 = vadd.f32 %v1710_v9, %v975_v24  ;;  %v1441_v28 = vpop.f32.mrb[20].mxu1  ;;  %v1378_v29 = vpop.f32.mrb[21].mxu0 }
 0x130   : > { %v1379_v30 = vadd.f32 %v1378_v29, %v1377_v25  ;;  %v1442_v31 = vpop.f32.mrb[21].mxu1  ;;  %v1380_v32 = vpop.f32.mrb[22].mxu0 }
 0x131   : > { %1100 = vst [vmem:[%s1717_s29 + $0x40] sm:$0xff] %v1084_v26  ;;  %v1085_v33 = vmax.f32 %v1069_v27, 0.0  ;;  %v1443_v34 = vadd.f32 %v1442_v31, %v1441_v28  ;;  %v1444_v35 = vpop.f32.mrb[22].mxu1  ;;  %v1381_v36 = vpop.f32.mrb[23].mxu0 }
 0x132   : > { %v1382_v37 = vadd.f32 %v1381_v36, %v1380_v32  ;;  %v1445_v38 = vpop.f32.mrb[23].mxu1 }
 0x133   : > { %1101 = vst [vmem:[%s1717_s29 + $0x48] sm:$0xff] %v1085_v33  ;;  %v980_v39 = vadd.f32 %v1443_v34, %v1379_v30  ;;  %v1446_v40 = vadd.f32 %v1445_v38, %v1444_v35 }
 0x135   : > { %v1070_v41 = vadd.f32 %v1710_v9, %v980_v39  ;;  %v983_v42 = vadd.f32 %v1446_v40, %v1382_v37 }
 0x136   : > { %v1383_v43 = vpop.f32.mrb[24].mxu0 }
 0x137   : > { %v1086_v44 = vmax.f32 %v1070_v41, 0.0  ;;  %v1071_v45 = vadd.f32 %v1710_v9, %v983_v42  ;;  %v1447_v46 = vpop.f32.mrb[24].mxu1  ;;  %v1384_v47 = vpop.f32.mrb[25].mxu0 }
 0x138   : > { %v1385_v48 = vadd.f32 %v1384_v47, %v1383_v43  ;;  %v1448_v49 = vpop.f32.mrb[25].mxu1  ;;  %v1386_v50 = vpop.f32.mrb[26].mxu0 }
 0x139   : > { %1102 = vst [vmem:[%s1717_s29 + $0x50] sm:$0xff] %v1086_v44  ;;  %v1087_v51 = vmax.f32 %v1071_v45, 0.0  ;;  %v1449_v52 = vadd.f32 %v1448_v49, %v1447_v46  ;;  %v1450_v53 = vpop.f32.mrb[26].mxu1  ;;  %v1387_v54 = vpop.f32.mrb[27].mxu0 }
 0x13a   : > { %v1388_v55 = vadd.f32 %v1387_v54, %v1386_v50  ;;  %v1451_v56 = vpop.f32.mrb[27].mxu1 }
 0x13b   : > { %1103 = vst [vmem:[%s1717_s29 + $0x58] sm:$0xff] %v1087_v51  ;;  %v988_v57 = vadd.f32 %v1449_v52, %v1385_v48  ;;  %v1452_v58 = vadd.f32 %v1451_v56, %v1450_v53 }
 0x13d   : > { %v1072_v59 = vadd.f32 %v1710_v9, %v988_v57  ;;  %v991_v60 = vadd.f32 %v1452_v58, %v1388_v55 }
 0x13e   : > { %v1389_v61 = vpop.f32.mrb[28].mxu0 }
 0x13f   : > { %v1088_v62 = vmax.f32 %v1072_v59, 0.0  ;;  %v1073_v63 = vadd.f32 %v1710_v9, %v991_v60  ;;  %v1453_v0 = vpop.f32.mrb[28].mxu1  ;;  %v1390_v1 = vpop.f32.mrb[29].mxu0 }
 0x140   : > { %v1391_v2 = vadd.f32 %v1390_v1, %v1389_v61  ;;  %v1454_v3 = vpop.f32.mrb[29].mxu1  ;;  %v1392_v4 = vpop.f32.mrb[30].mxu0 }
 0x141   : > { %1104 = vst [vmem:[%s1717_s29 + $0x60] sm:$0xff] %v1088_v62  ;;  %v1089_v5 = vmax.f32 %v1073_v63, 0.0  ;;  %v1455_v6 = vadd.f32 %v1454_v3, %v1453_v0  ;;  %v1456_v7 = vpop.f32.mrb[30].mxu1  ;;  %v1393_v8 = vpop.f32.mrb[31].mxu0 }
 0x142   : > { %v1394_v10 = vadd.f32 %v1393_v8, %v1392_v4  ;;  %v1457_v11 = vpop.f32.mrb[31].mxu1 }
 0x143   : > { %1105 = vst [vmem:[%s1717_s29 + $0x68] sm:$0xff] %v1089_v5  ;;  %v996_v12 = vadd.f32 %v1455_v6, %v1391_v2  ;;  %v1458_v13 = vadd.f32 %v1457_v11, %v1456_v7 }
 0x145   : > { %v1074_v14 = vadd.f32 %v1710_v9, %v996_v12  ;;  %v999_v15 = vadd.f32 %v1458_v13, %v1394_v10 }
 0x147   : > { %v1090_v16 = vmax.f32 %v1074_v14, 0.0  ;;  %v1075_v17 = vadd.f32 %v1710_v9, %v999_v15 }
 0x149   : > { %1106 = vst [vmem:[%s1717_s29 + $0x70] sm:$0xff] %v1090_v16  ;;  %v1091_v18 = vmax.f32 %v1075_v17, 0.0 }
 0x14b   : > { %1107 = vst [vmem:[%s1717_s29 + $0x78] sm:$0xff] %v1091_v18 }
 0x14c PF: > { %s13_s14 = sadd.s32 1, %s1585_s14   ;;  %s1763_s12 = smov %s1581_s13 }
 0x14d   : > { %p10_p5 = scmp.ge.s32.totalorder %s13_s14, 6   ;;  %s1764_s13 = smov %s1766_s15 }
 0x14f   :  { %12 = sbr.rel (!%p10_p5) target bundleno = 2 (0x2), region = 76 }

// kernel: ppm_forward.3
= control target key start
LH: loop header
LB: loop body
LE: loop exit
PB: predicated region body
PF: predicated region fallthrough
CT: control target
= control target key end

     0   :  { %8 = vsyncpa [#allocation4], 0  ;;  %s4412_s0 = inlined_call_operand.vmem [shape: f32[2,256,512], index: 0, kind: input, shape index: {}]   ;;  %s4413_s1 = inlined_call_operand.vmem [shape: f32[4,256,64], index: 1, kind: input, shape index: {}]   ;;  %s4414_s2 = inlined_call_operand.vmem [shape: f32[4,2,64,128], index: 2, kind: input, shape index: {}]   ;;  %s4415_s3 = inlined_call_operand.hbm [shape: f32[2,256,1024], index: 3, kind: output, shape index: {}]  }
   0x1   :  { %10 = vsyncpa [#allocation4 + $0x1], 0  ;;  %s3280_s12 = smov 0   ;;  %s3282_s13 = smov 0  }
   0x2   :  { %s3284_s14 = smov 0   ;;  %s3286_s15 = smov 0  }
   0x3   :  { %s3288_s16 = smov 0   ;;  %s3290_s17 = smov 0  }
   0x4 LB: > { %s2371_s18 = sadd.s32 4294967295, %s3255_s17   ;;  %s2372_s19 = sadd.s32 4294967294, %s3255_s17   ;;  %s3255_s17 = sphi %s3290_s17, %s16_s17   ;;  %s3251_s16 = sphi %s3288_s16, %s4422_s16   ;;  %s3247_s15 = sphi %s3286_s15, %s4421_s15   ;;  %s3243_s14 = sphi %s3284_s14, %s4420_s14   ;;  %s3239_s13 = sphi %s3282_s13, %s4419_s13   ;;  %s3235_s12 = sphi %s3280_s12, %s4418_s12  }
   0x5   : > { %s28_s20 = sadd.s32 1, %s3251_s16  ;;  %s89_s21 = sadd.s32 1, %s3243_s14 }
   0x6   : > { %p30_p0 = scmp.ge.s32.totalorder %s28_s20, 2  ;;  %p96_p1 = scmp.ne.s32.totalorder %s3243_s14, %s3239_s13 }
   0x7   : > { %p97_p2 = scmp.eq.s32.totalorder %s3255_s17, 0  ;;  %p128_p3 = scmp.eq.s32.totalorder %s2371_s18, 1 }
   0x8   : > { %s4424_s20 = smov (%p30_p0, %s28_s20), 0  ;;  %p133_p6 = scmp.ne.s32.totalorder %s3239_s13, %s3235_s12 }
   0x9   : > { %p98_p4 = por %p97_p2, %p96_p1  ;;  %p3319_p5 = por %p128_p3, %p96_p1 }
   0xa   : > { %s86_s23 = ssub.s32 %s3251_s16, %s4424_s20  ;;  %p134_p8 = scmp.eq.s32.totalorder %s2372_s19, 1 }
   0xb   : > { %p87_p7 = scmp.eq.s32.totalorder %s86_s23, 0  ;;  %p2375_p10 = scmp.ge.s32.totalorder %s3255_s17, 2 }
   0xc   : > { %p3330_p9 = por %p134_p8, %p133_p6 }
   0xd   : > { %s3328_s24 = scalar_select %p87_p7, %s3243_s14, %s89_s21  }
   0xe   : > { %159 = sbr.rel (%p2375_p10) target bundleno = 41 (0x29), region = 20 }
  0x15   : > { %176 = sbr.rel (!%p98_p4) target bundleno = 41 (0x29), region = 28  ;;  %s178_s26 = sand.u32 (%p98_p4), 1, %s3243_s14  }
  0x16   : > { %s2637_s27 = sshll.u32 (%p98_p4), %s3251_s16, 6  ;;  %s2376_s28 = sshll.u32 (%p98_p4), %s178_s26, 8 }
  0x17   : > { %s3342_s4 = scalar_lea.vmem (%p98_p4), %s4414_s2, %s2637_s27  ;;  %s3347_s5 = scalar_lea.vmem (%p98_p4), [#allocation2], %s2376_s28 }
  0x18   : > { %v273_v0 = vld [vmem:[%s3342_s4] sm:$0xff] (%p98_p4)  ;;  %v275_v1 = vld [vmem:[%s3342_s4 + $0x8] sm:$0xff] (%p98_p4)  ;;  %v277_v2 = vld [vmem:[%s3342_s4 + $0x10] sm:$0xff] (%p98_p4) }
  0x19   : > { %274 = vst [vmem:[%s3347_s5] sm:$0xff] (%p98_p4), %v273_v0  ;;  %276 = vst [vmem:[%s3347_s5 + $0x8] sm:$0xff] (%p98_p4), %v275_v1  ;;  %v279_v3 = vld [vmem:[%s3342_s4 + $0x18] sm:$0xff] (%p98_p4)  ;;  %v281_v4 = vld [vmem:[%s3342_s4 + $0x20] sm:$0xff] (%p98_p4) }
  0x1a   : > { %278 = vst [vmem:[%s3347_s5 + $0x10] sm:$0xff] (%p98_p4), %v277_v2  ;;  %v283_v5 = vld [vmem:[%s3342_s4 + $0x28] sm:$0xff] (%p98_p4)  ;;  %280 = vst [vmem:[%s3347_s5 + $0x18] sm:$0xff] (%p98_p4), %v279_v3  ;;  %v285_v6 = vld [vmem:[%s3342_s4 + $0x30] sm:$0xff] (%p98_p4) }
  0x1b   : > { %282 = vst [vmem:[%s3347_s5 + $0x20] sm:$0xff] (%p98_p4), %v281_v4  ;;  %284 = vst [vmem:[%s3347_s5 + $0x28] sm:$0xff] (%p98_p4), %v283_v5  ;;  %v287_v7 = vld [vmem:[%s3342_s4 + $0x38] sm:$0xff] (%p98_p4)  ;;  %v289_v8 = vld [vmem:[%s3342_s4 + $0x80] sm:$0xff] (%p98_p4) }
  0x1c   : > { %286 = vst [vmem:[%s3347_s5 + $0x30] sm:$0xff] %v285_v6  ;;  %288 = vst [vmem:[%s3347_s5 + $0x38] sm:$0xff] %v287_v7  ;;  %v291_v9 = vld [vmem:[%s3342_s4 + $0x88] sm:$0xff]  ;;  %v293_v10 = vld [vmem:[%s3342_s4 + $0x90] sm:$0xff] }
  0x1d   : > { %290 = vst [vmem:[%s3347_s5 + $0x40] sm:$0xff] %v289_v8  ;;  %v295_v11 = vld [vmem:[%s3342_s4 + $0x98] sm:$0xff]  ;;  %292 = vst [vmem:[%s3347_s5 + $0x48] sm:$0xff] %v291_v9  ;;  %v297_v12 = vld [vmem:[%s3342_s4 + $0xa0] sm:$0xff] }
  0x1e   : > { %294 = vst [vmem:[%s3347_s5 + $0x50] sm:$0xff] %v293_v10  ;;  %296 = vst [vmem:[%s3347_s5 + $0x58] sm:$0xff] %v295_v11  ;;  %v299_v13 = vld [vmem:[%s3342_s4 + $0xa8] sm:$0xff]  ;;  %v301_v14 = vld [vmem:[%s3342_s4 + $0xb0] sm:$0xff] }
  0x1f   : > { %298 = vst [vmem:[%s3347_s5 + $0x60] sm:$0xff] %v297_v12  ;;  %300 = vst [vmem:[%s3347_s5 + $0x68] sm:$0xff] %v299_v13  ;;  %v303_v15 = vld [vmem:[%s3342_s4 + $0xb8] sm:$0xff]  ;;  %v305_v16 = vld [vmem:[%s3342_s4 + $0x100] sm:$0xff] }
  0x20   : > { %302 = vst [vmem:[%s3347_s5 + $0x70] sm:$0xff] %v301_v14  ;;  %v307_v17 = vld [vmem:[%s3342_s4 + $0x108] sm:$0xff]  ;;  %304 = vst [vmem:[%s3347_s5 + $0x78] sm:$0xff] %v303_v15  ;;  %v309_v18 = vld [vmem:[%s3342_s4 + $0x110] sm:$0xff] }
  0x21   : > { %306 = vst [vmem:[%s3347_s5 + $0x80] sm:$0xff] %v305_v16  ;;  %308 = vst [vmem:[%s3347_s5 + $0x88] sm:$0xff] %v307_v17  ;;  %v311_v19 = vld [vmem:[%s3342_s4 + $0x118] sm:$0xff]  ;;  %v313_v20 = vld [vmem:[%s3342_s4 + $0x120] sm:$0xff] }
  0x22   : > { %310 = vst [vmem:[%s3347_s5 + $0x90] sm:$0xff] %v309_v18  ;;  %312 = vst [vmem:[%s3347_s5 + $0x98] sm:$0xff] %v311_v19  ;;  %v315_v21 = vld [vmem:[%s3342_s4 + $0x128] sm:$0xff]  ;;  %v317_v22 = vld [vmem:[%s3342_s4 + $0x130] sm:$0xff] }
  0x23   : > { %314 = vst [vmem:[%s3347_s5 + $0xa0] sm:$0xff] %v313_v20  ;;  %v319_v23 = vld [vmem:[%s3342_s4 + $0x138] sm:$0xff]  ;;  %316 = vst [vmem:[%s3347_s5 + $0xa8] sm:$0xff] %v315_v21  ;;  %v321_v24 = vld [vmem:[%s3342_s4 + $0x180] sm:$0xff] }
  0x24   : > { %318 = vst [vmem:[%s3347_s5 + $0xb0] sm:$0xff] %v317_v22  ;;  %320 = vst [vmem:[%s3347_s5 + $0xb8] sm:$0xff] %v319_v23  ;;  %v323_v25 = vld [vmem:[%s3342_s4 + $0x188] sm:$0xff]  ;;  %v325_v26 = vld [vmem:[%s3342_s4 + $0x190] sm:$0xff] }
  0x25   : > { %322 = vst [vmem:[%s3347_s5 + $0xc0] sm:$0xff] %v321_v24  ;;  %324 = vst [vmem:[%s3347_s5 + $0xc8] sm:$0xff] %v323_v25  ;;  %v327_v27 = vld [vmem:[%s3342_s4 + $0x198] sm:$0xff]  ;;  %v329_v28 = vld [vmem:[%s3342_s4 + $0x1a0] sm:$0xff] }
  0x26   : > { %326 = vst [vmem:[%s3347_s5 + $0xd0] sm:$0xff] %v325_v26  ;;  %v331_v29 = vld [vmem:[%s3342_s4 + $0x1a8] sm:$0xff]  ;;  %328 = vst [vmem:[%s3347_s5 + $0xd8] sm:$0xff] %v327_v27  ;;  %v333_v30 = vld [vmem:[%s3342_s4 + $0x1b0] sm:$0xff] }
  0x27   : > { %330 = vst [vmem:[%s3347_s5 + $0xe0] sm:$0xff] %v329_v28  ;;  %332 = vst [vmem:[%s3347_s5 + $0xe8] sm:$0xff] %v331_v29  ;;  %v335_v31 = vld [vmem:[%s3342_s4 + $0x1b8] sm:$0xff] }
  0x28   : > { %334 = vst [vmem:[%s3347_s5 + $0xf0] sm:$0xff] %v333_v30  ;;  %336 = vst [vmem:[%s3347_s5 + $0xf8] sm:$0xff] %v335_v31 }
  0x29 PF: > { %p2379_p11 = scmp.ge.s32.totalorder %s3255_s17, 1  ;;  %p341_p12 = scmp.lt.s32.totalorder %s3255_s17, 3 }
  0x2b   : > { %p342_p13 = pnand %p2379_p11, %p341_p12 }
  0x2c   : > { %s3413_s6 = sand.u32 (!%p342_p13), 1, %s3239_s13   ;;  %v660_v32 = vld [vmem:[%s4413_s1] sm:$0xff] (!%p342_p13)  ;;  %vm700_vm0 = vcmask (!%p342_p13), 523264   ;;  %v661_v2 = vld [vmem:[%s4413_s1 + $0x8] sm:$0xff] (!%p342_p13)  ;;  %v662_v6 = vld [vmem:[%s4413_s1 + $0x10] sm:$0xff] (!%p342_p13)  ;;  %p387_p0 = scmp.lt.s32.totalorder (!%p342_p13), %s3247_s15, 1 }
  0x2d   : > { %345 = sbr.rel (%p342_p13) target bundleno = 419 (0x1a3), region = 66  ;;  %v2416_v33 = vld [vmem:[%s4413_s1 + $0x100] sm:$0xff] (!%p342_p13)  ;;  %s2380_s11 = sshll.u32 (!%p342_p13), %s3413_s6, 8  ;;  %2816 = vmatprep.mubr.msk.f32.mxu0 (!%p342_p13), %vm700_vm0, %v660_v32  ;;  %v2417_v5 = vld [vmem:[%s4413_s1 + $0x108] sm:$0xff] (!%p342_p13)  ;;  %v2418_v8 = vld [vmem:[%s4413_s1 + $0x110] sm:$0xff] (!%p342_p13) }
  0x2e   : > { %2880 = vmatprep.mubr.msk.f32.mxu1 (!%p342_p13), %vm700_vm0, %v2416_v33  ;;  %s3424_s18 = scalar_lea.vmem (!%p342_p13), [#allocation2], %s2380_s11  ;;  %v663_v12 = vld [vmem:[%s4413_s1 + $0x18] sm:$0xff] (!%p342_p13)  ;;  %v664_v16 = vld [vmem:[%s4413_s1 + $0x20] sm:$0xff] (!%p342_p13)  ;;  %v665_v19 = vld [vmem:[%s4413_s1 + $0x28] sm:$0xff] (!%p342_p13)  ;;  %s2381_s10 = sshll.u32 (!%p342_p13), %s3413_s6, 11 }
  0x2f   : > { %v692_v34 = vld [vmem:[%s3424_s18] sm:$0xff] (!%p342_p13)  ;;  %v693_v35 = vld [vmem:[%s3424_s18 + $0x8] sm:$0xff] (!%p342_p13)  ;;  %v694_v39 = vld [vmem:[%s3424_s18 + $0x10] sm:$0xff] (!%p342_p13)  ;;  %s3976_s26 = scalar_lea.vmem (!%p342_p13), [#allocation3], %s2381_s10  ;;  %s2639_s27 = sshll.u32 (!%p342_p13), %s3247_s15, 15 }
  0x30   : > { %v2448_v36 = vld [vmem:[%s3424_s18 + $0x40] sm:$0xff] (!%p342_p13)  ;;  %v3056_v37 = vpack.c.bf16 (!%p342_p13), %v693_v35, %v692_v34  ;;  %v2449_v38 = vld [vmem:[%s3424_s18 + $0x48] sm:$0xff] (!%p342_p13)  ;;  %v695_v40 = vld [vmem:[%s3424_s18 + $0x18] sm:$0xff] (!%p342_p13)  ;;  %s2256_s28 = sshll.u32 (!%p342_p13), %s3976_s26, 4  ;;  %s4357_s4 = scalar_lea.hbm (!%p342_p13), %s4415_s3, %s2639_s27  ;;  %s4359_s28 = int_to_ptr.vmem [resolvable:$true] %s2256_s28 }
  0x31   : > { %v3072_v41 = vpack.c.bf16 (!%p342_p13), %v2449_v38, %v2448_v36  ;;  %v3060_v42 = vpack.c.bf16 (!%p342_p13), %v695_v40, %v694_v39  ;;  %v2450_v43 = vld [vmem:[%s3424_s18 + $0x50] sm:$0xff] (!%p342_p13)  ;;  %v2451_v44 = vld [vmem:[%s3424_s18 + $0x58] sm:$0xff] (!%p342_p13)  ;;  %v696_v45 = vld [vmem:[%s3424_s18 + $0x20] sm:$0xff] (!%p342_p13)  ;;  %s3257_s5 = smov (!%p342_p13), [#allocation3]  }
  0x32   : > { %3057 = vmatprep.subr.bf16.mxu0 (!%p342_p13), %v3056_v37  ;;  %v3076_v46 = vpack.c.bf16 (!%p342_p13), %v2451_v44, %v2450_v43  ;;  %v697_v47 = vld [vmem:[%s3424_s18 + $0x28] sm:$0xff] (!%p342_p13)  ;;  %v2452_v48 = vld [vmem:[%s3424_s18 + $0x60] sm:$0xff] (!%p342_p13)  ;;  %v698_v52 = vld [vmem:[%s3424_s18 + $0x30] sm:$0xff] (!%p342_p13)  ;;  %s3181_s7 = sshll.u32 (!%p342_p13), %s3257_s5, 4  ;;  %s3182_s7 = int_to_ptr.vmem [resolvable:$false] %s3181_s7 }
  0x33   : > { %v2453_v49 = vld [vmem:[%s3424_s18 + $0x68] sm:$0xff] (!%p342_p13)  ;;  %3073 = vmatprep.subr.bf16.mxu1 (!%p342_p13), %v3072_v41  ;;  %3059 = vmatpush3.bf16.msra.mxu0 (!%p342_p13), %v3056_v37  ;;  %v3064_v50 = vpack.c.bf16 (!%p342_p13), %v697_v47, %v696_v45  ;;  %v699_v53 = vld [vmem:[%s3424_s18 + $0x38] sm:$0xff] (!%p342_p13)  ;;  %v2454_v54 = vld [vmem:[%s3424_s18 + $0x70] sm:$0xff] (!%p342_p13)  ;;  %s3183_s8 = scalar_lea.vmem (!%p342_p13), %s3182_s7, 65536  ;;  %p3184_p4 = scmp.lt.s32.totalorder (!%p342_p13), %s4359_s28, %s3182_s7 }
  0x34   : > { %3075 = vmatpush3.bf16.msra.mxu1 %v3072_v41  ;;  %3061 = vmatprep.subr.bf16.mxu0 %v3060_v42  ;;  %v3080_v51 = vpack.c.bf16 %v2453_v49, %v2452_v48  ;;  %v2455_v55 = vld [vmem:[%s3424_s18 + $0x78] sm:$0xff]  ;;  %v3068_v56 = vpack.c.bf16 %v699_v53, %v698_v52  ;;  %v2520_v58 = vld [vmem:[%s3424_s18 + $0x80] sm:$0xff]  ;;  %v2521_v59 = vld [vmem:[%s3424_s18 + $0x88] sm:$0xff]  ;;  %s388_s9 = scalar_select %p387_p0, %s3247_s15, 1 }
  0x35   : > { %3077 = vmatprep.subr.bf16.mxu1 %v3076_v46  ;;  %v3084_v57 = vpack.c.bf16 %v2455_v55, %v2454_v54  ;;  %v2592_v60 = vld [vmem:[%s3424_s18 + $0xc0] sm:$0xff]  ;;  %v2593_v61 = vld [vmem:[%s3424_s18 + $0xc8] sm:$0xff]  ;;  %v3088_v62 = vpack.c.bf16 %v2521_v59, %v2520_v58  ;;  %v2522_v0 = vld [vmem:[%s3424_s18 + $0x90] sm:$0xff]  ;;  %s2240_s15 = scalar_lea.sflag [#allocation4], %s3413_s6 }
  0x36   : > { %v3104_v63 = vpack.c.bf16 %v2593_v61, %v2592_v60  ;;  %v2523_v1 = vld [vmem:[%s3424_s18 + $0x98] sm:$0xff]  ;;  %v2594_v3 = vld [vmem:[%s3424_s18 + $0xd0] sm:$0xff]  ;;  %v2524_v10 = vld [vmem:[%s3424_s18 + $0xa0] sm:$0xff]  ;;  %s2638_s11 = sshll.u32 %s388_s9, 10 }
  0x37   : > { %3063 = vmatpush3.bf16.msra.mxu0 %v3060_v42  ;;  %v2595_v4 = vld [vmem:[%s3424_s18 + $0xd8] sm:$0xff]  ;;  %v3092_v7 = vpack.c.bf16 %v2523_v1, %v2522_v0  ;;  %v2525_v11 = vld [vmem:[%s3424_s18 + $0xa8] sm:$0xff]  ;;  %v2596_v13 = vld [vmem:[%s3424_s18 + $0xe0] sm:$0xff]  ;;  %s3968_s23 = scalar_lea.vmem %s4412_s0, %s2638_s11 }
  0x38   : > { %3079 = vmatpush3.bf16.msra.mxu1 %v3076_v46  ;;  %3065 = vmatprep.subr.bf16.mxu0 %v3064_v50  ;;  %v3108_v9 = vpack.c.bf16 %v2595_v4, %v2594_v3  ;;  %v2597_v14 = vld [vmem:[%s3424_s18 + $0xe8] sm:$0xff]  ;;  %v2419_v15 = vld [vmem:[%s4413_s1 + $0x118] sm:$0xff]  ;;  %v2420_v17 = vld [vmem:[%s4413_s1 + $0x120] sm:$0xff]  ;;  %v3096_v18 = vpack.c.bf16 %v2525_v11, %v2524_v10 }
  0x39   : > { %3081 = vmatprep.subr.bf16.mxu1 %v3080_v51  ;;  %v3112_v20 = vpack.c.bf16 %v2597_v14, %v2596_v13  ;;  %v2526_v21 = vld [vmem:[%s3424_s18 + $0xb0] sm:$0xff]  ;;  %v2527_v22 = vld [vmem:[%s3424_s18 + $0xb8] sm:$0xff]  ;;  %v2421_v25 = vld [vmem:[%s4413_s1 + $0x128] sm:$0xff] }
  0x3a   : > { %v2598_v23 = vld [vmem:[%s3424_s18 + $0xf0] sm:$0xff]  ;;  %v2599_v24 = vld [vmem:[%s3424_s18 + $0xf8] sm:$0xff]  ;;  %v3100_v28 = vpack.c.bf16 %v2527_v22, %v2526_v21  ;;  %v668_v32 = vld [vmem:[%s4413_s1 + $0x40] sm:$0xff]  ;;  %s3177_s18 = scalar_lea.vmem %s4359_s28, 32768 }
  0x3b   : > { %3067 = vmatpush3.bf16.msra.mxu0 %v3064_v50  ;;  %v666_v26 = vld [vmem:[%s4413_s1 + $0x30] sm:$0xff]  ;;  %v3116_v29 = vpack.c.bf16 %v2599_v24, %v2598_v23  ;;  %v667_v30 = vld [vmem:[%s4413_s1 + $0x38] sm:$0xff]  ;;  %v2424_v33 = vld [vmem:[%s4413_s1 + $0x140] sm:$0xff]  ;;  %p3178_p1 = scmp.ne.s32.totalorder %s4359_s28, %s3177_s18  ;;  %p3185_p6 = scmp.lt.s32.totalorder %s3183_s8, %s3177_s18 }
  0x3c   : > { %3083 = vmatpush3.bf16.msra.mxu1 %v3080_v51  ;;  %3069 = vmatprep.subr.bf16.mxu0 %v3068_v56  ;;  %v2422_v27 = vld [vmem:[%s4413_s1 + $0x130] sm:$0xff]  ;;  %v2423_v31 = vld [vmem:[%s4413_s1 + $0x138] sm:$0xff]  ;;  %v669_v34 = vld [vmem:[%s4413_s1 + $0x48] sm:$0xff] }
  0x3d   : > { %3085 = vmatprep.subr.bf16.mxu1 %v3084_v57  ;;  %v2425_v35 = vld [vmem:[%s4413_s1 + $0x148] sm:$0xff]  ;;  %v670_v36 = vld [vmem:[%s4413_s1 + $0x50] sm:$0xff]  ;;  %v671_v38 = vld [vmem:[%s4413_s1 + $0x58] sm:$0xff]  ;;  %p3179_p2 = pnand %p3178_p1, %p3319_p5  ;;  %p3186_p7 = por %p3185_p6, %p3184_p4 }
  0x3e   : > { %v2426_v37 = vld [vmem:[%s4413_s1 + $0x150] sm:$0xff]  ;;  %v2427_v39 = vld [vmem:[%s4413_s1 + $0x158] sm:$0xff]  ;;  %v672_v40 = vld [vmem:[%s4413_s1 + $0x60] sm:$0xff] }
  0x3f   : > { %3071 = vmatpush3.bf16.msra.mxu0 %v3068_v56  ;;  %v2428_v41 = vld [vmem:[%s4413_s1 + $0x160] sm:$0xff]  ;;  %v673_v42 = vld [vmem:[%s4413_s1 + $0x68] sm:$0xff]  ;;  %v674_v44 = vld [vmem:[%s4413_s1 + $0x70] sm:$0xff]  ;;  %p3180_p3 = pneg %p3179_p2 }
  0x40   : > { %3087 = vmatpush3.bf16.msra.mxu1 %v3084_v57  ;;  %3089 = vmatprep.subr.bf16.mxu0 %v3088_v62  ;;  %v2429_v43 = vld [vmem:[%s4413_s1 + $0x168] sm:$0xff]  ;;  %v2430_v45 = vld [vmem:[%s4413_s1 + $0x170] sm:$0xff]  ;;  %v675_v46 = vld [vmem:[%s4413_s1 + $0x78] sm:$0xff] }
  0x41   : > { %3105 = vmatprep.subr.bf16.mxu1 %v3104_v63  ;;  %v2431_v47 = vld [vmem:[%s4413_s1 + $0x178] sm:$0xff]  ;;  %v676_v48 = vld [vmem:[%s4413_s1 + $0x80] sm:$0xff]  ;;  %v677_v50 = vld [vmem:[%s4413_s1 + $0x88] sm:$0xff]  ;;  %p3187_p8 = pnand %p3186_p7, %p3180_p3 }
  0x42   : > { %2817 = vmatmul.mubr.msk.f32.vlgmr.msra.gmra.mrb[0].mxu0 %vm700_vm0, %v661_v2  ;;  %v2432_v49 = vld [vmem:[%s4413_s1 + $0x180] sm:$0xff]  ;;  %v2433_v51 = vld [vmem:[%s4413_s1 + $0x188] sm:$0xff]  ;;  %v678_v52 = vld [vmem:[%s4413_s1 + $0x90] sm:$0xff] }
  0x43   : > { %2881 = vmatmul.mubr.msk.f32.vlgmr.msra.gmra.mrb[0].mxu1 %vm700_vm0, %v2417_v5  ;;  %3091 = vmatpush3.bf16.msra.mxu0 %v3088_v62  ;;  %v2434_v53 = vld [vmem:[%s4413_s1 + $0x190] sm:$0xff]  ;;  %v679_v54 = vld [vmem:[%s4413_s1 + $0x98] sm:$0xff]  ;;  %v680_v56 = vld [vmem:[%s4413_s1 + $0xa0] sm:$0xff] }
  0x44   : > { %3107 = vmatpush3.bf16.msra.mxu1 %v3104_v63  ;;  %2819 = vmatprep.mubr.msk.f32.mxu0 %vm700_vm0, %v662_v6  ;;  %v2435_v55 = vld [vmem:[%s4413_s1 + $0x198] sm:$0xff]  ;;  %v2436_v57 = vld [vmem:[%s4413_s1 + $0x1a0] sm:$0xff]  ;;  %v681_v58 = vld [vmem:[%s4413_s1 + $0xa8] sm:$0xff] }
  0x45   : > { %2883 = vmatprep.mubr.msk.f32.mxu1 %vm700_vm0, %v2418_v8  ;;  %3093 = vmatprep.subr.bf16.mxu0 %v3092_v7  ;;  %v2437_v59 = vld [vmem:[%s4413_s1 + $0x1a8] sm:$0xff]  ;;  %v682_v60 = vld [vmem:[%s4413_s1 + $0xb0] sm:$0xff]  ;;  %v683_v62 = vld [vmem:[%s4413_s1 + $0xb8] sm:$0xff] }
  0x46   : > { %2820 = vmatmul.mubr.msk.f32.gmra.mrb[2].mxu0 %vm700_vm0, %v663_v12  ;;  %3109 = vmatprep.subr.bf16.mxu1 %v3108_v9  ;;  %v2438_v61 = vld [vmem:[%s4413_s1 + $0x1b0] sm:$0xff]  ;;  %v2439_v63 = vld [vmem:[%s4413_s1 + $0x1b8] sm:$0xff]  ;;  %v684_v0 = vld [vmem:[%s4413_s1 + $0xc0] sm:$0xff] }
  0x47   : > { %2884 = vmatmul.mubr.msk.f32.gmra.mrb[2].mxu1 %vm700_vm0, %v2419_v15  ;;  %2822 = vmatprep.mubr.msk.f32.mxu0 %vm700_vm0, %v664_v16  ;;  %v2440_v1 = vld [vmem:[%s4413_s1 + $0x1c0] sm:$0xff]  ;;  %v685_v2 = vld [vmem:[%s4413_s1 + $0xc8] sm:$0xff]  ;;  %v686_v4 = vld [vmem:[%s4413_s1 + $0xd0] sm:$0xff] }
  0x48   : > { %2886 = vmatprep.mubr.msk.f32.mxu1 %vm700_vm0, %v2420_v17  ;;  %3095 = vmatpush3.bf16.msra.mxu0 %v3092_v7  ;;  %v2441_v3 = vld [vmem:[%s4413_s1 + $0x1c8] sm:$0xff]  ;;  %v2442_v5 = vld [vmem:[%s4413_s1 + $0x1d0] sm:$0xff]  ;;  %v687_v6 = vld [vmem:[%s4413_s1 + $0xd8] sm:$0xff] }
  0x49   : > { %3111 = vmatpush3.bf16.msra.mxu1 %v3108_v9  ;;  %3097 = vmatprep.subr.bf16.mxu0 %v3096_v18  ;;  %v2443_v7 = vld [vmem:[%s4413_s1 + $0x1d8] sm:$0xff]  ;;  %v688_v8 = vld [vmem:[%s4413_s1 + $0xe0] sm:$0xff]  ;;  %v689_v10 = vld [vmem:[%s4413_s1 + $0xe8] sm:$0xff] }
  0x4a   : > { %2823 = vmatmul.mubr.msk.f32.gmra.mrb[4].mxu0 %vm700_vm0, %v665_v19  ;;  %3113 = vmatprep.subr.bf16.mxu1 %v3112_v20  ;;  %v2444_v9 = vld [vmem:[%s4413_s1 + $0x1e0] sm:$0xff]  ;;  %v2445_v11 = vld [vmem:[%s4413_s1 + $0x1e8] sm:$0xff]  ;;  %v690_v12 = vld [vmem:[%s4413_s1 + $0xf0] sm:$0xff] }
  0x4b   : > { %2887 = vmatmul.mubr.msk.f32.gmra.mrb[4].mxu1 %vm700_vm0, %v2421_v25  ;;  %2825 = vmatprep.mubr.msk.f32.mxu0 %vm700_vm0, %v666_v26  ;;  %v2446_v13 = vld [vmem:[%s4413_s1 + $0x1f0] sm:$0xff]  ;;  %v691_v14 = vld [vmem:[%s4413_s1 + $0xf8] sm:$0xff]  ;;  %v2488_v16 = vld [vmem:[%s4413_s1 + $0x200] sm:$0xff] }
  0x4c   : > { %2889 = vmatprep.mubr.msk.f32.mxu1 %vm700_vm0, %v2422_v27  ;;  %3099 = vmatpush3.bf16.msra.mxu0 %v3096_v18  ;;  %v2447_v15 = vld [vmem:[%s4413_s1 + $0x1f8] sm:$0xff]  ;;  %v2560_v17 = vld [vmem:[%s4413_s1 + $0x300] sm:$0xff]  ;;  %v2489_v18 = vld [vmem:[%s4413_s1 + $0x208] sm:$0xff] }
  0x4d   : > { %3115 = vmatpush3.bf16.msra.mxu1 %v3112_v20  ;;  %3101 = vmatprep.subr.bf16.mxu0 %v3100_v28  ;;  %v2561_v19 = vld [vmem:[%s4413_s1 + $0x308] sm:$0xff]  ;;  %v2490_v20 = vld [vmem:[%s4413_s1 + $0x210] sm:$0xff]  ;;  %v2491_v22 = vld [vmem:[%s4413_s1 + $0x218] sm:$0xff] }
  0x4e   : > { %2826 = vmatmul.mubr.msk.f32.gmra.mrb[6].mxu0 %vm700_vm0, %v667_v30  ;;  %3117 = vmatprep.subr.bf16.mxu1 %v3116_v29  ;;  %v2562_v21 = vld [vmem:[%s4413_s1 + $0x310] sm:$0xff]  ;;  %v2563_v23 = vld [vmem:[%s4413_s1 + $0x318] sm:$0xff]  ;;  %v2492_v24 = vld [vmem:[%s4413_s1 + $0x220] sm:$0xff] }
  0x4f   : > { %2890 = vmatmul.mubr.msk.f32.gmra.mrb[6].mxu1 %vm700_vm0, %v2423_v31  ;;  %2828 = vmatprep.mubr.msk.f32.mxu0 %vm700_vm0, %v668_v32  ;;  %v2564_v25 = vld [vmem:[%s4413_s1 + $0x320] sm:$0xff]  ;;  %v2493_v26 = vld [vmem:[%s4413_s1 + $0x228] sm:$0xff]  ;;  %v2495_v30 = vld [vmem:[%s4413_s1 + $0x238] sm:$0xff] }
  0x50   : > { %2892 = vmatprep.mubr.msk.f32.mxu1 %vm700_vm0, %v2424_v33  ;;  %3103 = vmatpush3.bf16.msra.mxu0 %v3100_v28  ;;  %v2565_v27 = vld [vmem:[%s4413_s1 + $0x328] sm:$0xff]  ;;  %v2494_v28 = vld [vmem:[%s4413_s1 + $0x230] sm:$0xff]  ;;  %v2567_v31 = vld [vmem:[%s4413_s1 + $0x338] sm:$0xff] }
  0x51   : > { %3119 = vmatpush3.bf16.msra.mxu1 %v3116_v29  ;;  %v2566_v29 = vld [vmem:[%s4413_s1 + $0x330] sm:$0xff]  ;;  %v2496_v32 = vld [vmem:[%s4413_s1 + $0x240] sm:$0xff] }
  0x52   : > { %2829 = vmatmul.mubr.msk.f32.gmra.mrb[8].mxu0 %vm700_vm0, %v669_v34  ;;  %v2568_v33 = vld [vmem:[%s4413_s1 + $0x340] sm:$0xff]  ;;  %v2497_v34 = vld [vmem:[%s4413_s1 + $0x248] sm:$0xff] }
  0x53   : > { %2893 = vmatmul.mubr.msk.f32.gmra.mrb[8].mxu1 %vm700_vm0, %v2425_v35  ;;  %2831 = vmatprep.mubr.msk.f32.mxu0 %vm700_vm0, %v670_v36  ;;  %v2569_v35 = vld [vmem:[%s4413_s1 + $0x348] sm:$0xff]  ;;  %v2498_v36 = vld [vmem:[%s4413_s1 + $0x250] sm:$0xff] }
  0x54   : > { %2895 = vmatprep.mubr.msk.f32.mxu1 %vm700_vm0, %v2426_v37  ;;  %v2570_v37 = vld [vmem:[%s4413_s1 + $0x350] sm:$0xff] }
  0x56   : > { %2832 = vmatmul.mubr.msk.f32.gmra.mrb[10].mxu0 %vm700_vm0, %v671_v38  ;;  %v2499_v38 = vld [vmem:[%s4413_s1 + $0x258] sm:$0xff] }
  0x57   : > { %2896 = vmatmul.mubr.msk.f32.gmra.mrb[10].mxu1 %vm700_vm0, %v2427_v39  ;;  %2834 = vmatprep.mubr.msk.f32.mxu0 %vm700_vm0, %v672_v40  ;;  %v2571_v39 = vld [vmem:[%s4413_s1 + $0x358] sm:$0xff]  ;;  %v2500_v40 = vld [vmem:[%s4413_s1 + $0x260] sm:$0xff] }
  0x58   : > { %2898 = vmatprep.mubr.msk.f32.mxu1 %vm700_vm0, %v2428_v41  ;;  %v2572_v41 = vld [vmem:[%s4413_s1 + $0x360] sm:$0xff] }
  0x5a   : > { %2835 = vmatmul.mubr.msk.f32.gmra.mrb[12].mxu0 %vm700_vm0, %v673_v42  ;;  %v2501_v42 = vld [vmem:[%s4413_s1 + $0x268] sm:$0xff] }
  0x5b   : > { %2899 = vmatmul.mubr.msk.f32.gmra.mrb[12].mxu1 %vm700_vm0, %v2429_v43  ;;  %2837 = vmatprep.mubr.msk.f32.mxu0 %vm700_vm0, %v674_v44  ;;  %v2573_v43 = vld [vmem:[%s4413_s1 + $0x368] sm:$0xff]  ;;  %v2502_v44 = vld [vmem:[%s4413_s1 + $0x270] sm:$0xff] }
  0x5c   : > { %2901 = vmatprep.mubr.msk.f32.mxu1 %vm700_vm0, %v2430_v45  ;;  %v2574_v45 = vld [vmem:[%s4413_s1 + $0x370] sm:$0xff] }
  0x5e   : > { %2838 = vmatmul.mubr.msk.f32.gmra.mrb[14].mxu0 %vm700_vm0, %v675_v46  ;;  %v2503_v46 = vld [vmem:[%s4413_s1 + $0x278] sm:$0xff] }
  0x5f   : > { %2902 = vmatmul.mubr.msk.f32.gmra.mrb[14].mxu1 %vm700_vm0, %v2431_v47  ;;  %2840 = vmatprep.mubr.msk.f32.mxu0 %vm700_vm0, %v676_v48  ;;  %v2575_v47 = vld [vmem:[%s4413_s1 + $0x378] sm:$0xff]  ;;  %v2504_v48 = vld [vmem:[%s4413_s1 + $0x280] sm:$0xff] }
  0x60   : > { %2904 = vmatprep.mubr.msk.f32.mxu1 %vm700_vm0, %v2432_v49  ;;  %v2576_v49 = vld [vmem:[%s4413_s1 + $0x380] sm:$0xff] }
  0x62   : > { %2841 = vmatmul.mubr.msk.f32.gmra.mrb[16].mxu0 %vm700_vm0, %v677_v50  ;;  %v2505_v50 = vld [vmem:[%s4413_s1 + $0x288] sm:$0xff] }
  0x63   : > { %2905 = vmatmul.mubr.msk.f32.gmra.mrb[16].mxu1 %vm700_vm0, %v2433_v51  ;;  %2843 = vmatprep.mubr.msk.f32.mxu0 %vm700_vm0, %v678_v52  ;;  %v2577_v51 = vld [vmem:[%s4413_s1 + $0x388] sm:$0xff]  ;;  %v2506_v52 = vld [vmem:[%s4413_s1 + $0x290] sm:$0xff] }
  0x64   : > { %2907 = vmatprep.mubr.msk.f32.mxu1 %vm700_vm0, %v2434_v53  ;;  %v2578_v53 = vld [vmem:[%s4413_s1 + $0x390] sm:$0xff] }
  0x66   : > { %2844 = vmatmul.mubr.msk.f32.gmra.mrb[18].mxu0 %vm700_vm0, %v679_v54  ;;  %v2507_v54 = vld [vmem:[%s4413_s1 + $0x298] sm:$0xff] }
  0x67   : > { %2908 = vmatmul.mubr.msk.f32.gmra.mrb[18].mxu1 %vm700_vm0, %v2435_v55  ;;  %2846 = vmatprep.mubr.msk.f32.mxu0 %vm700_vm0, %v680_v56  ;;  %v2579_v55 = vld [vmem:[%s4413_s1 + $0x398] sm:$0xff]  ;;  %v2508_v56 = vld [vmem:[%s4413_s1 + $0x2a0] sm:$0xff] }
  0x68   : > { %2910 = vmatprep.mubr.msk.f32.mxu1 %vm700_vm0, %v2436_v57  ;;  %v2580_v57 = vld [vmem:[%s4413_s1 + $0x3a0] sm:$0xff] }
  0x6a   : > { %2847 = vmatmul.mubr.msk.f32.gmra.mrb[20].mxu0 %vm700_vm0, %v681_v58  ;;  %v2509_v58 = vld [vmem:[%s4413_s1 + $0x2a8] sm:$0xff] }
  0x6b   : > { %2911 = vmatmul.mubr.msk.f32.gmra.mrb[20].mxu1 %vm700_vm0, %v2437_v59  ;;  %2849 = vmatprep.mubr.msk.f32.mxu0 %vm700_vm0, %v682_v60  ;;  %v2581_v59 = vld [vmem:[%s4413_s1 + $0x3a8] sm:$0xff]  ;;  %v2510_v60 = vld [vmem:[%s4413_s1 + $0x2b0] sm:$0xff] }
  0x6c   : > { %2913 = vmatprep.mubr.msk.f32.mxu1 %vm700_vm0, %v2438_v61  ;;  %v2582_v61 = vld [vmem:[%s4413_s1 + $0x3b0] sm:$0xff] }
  0x6e   : > { %2850 = vmatmul.mubr.msk.f32.gmra.mrb[22].mxu0 %vm700_vm0, %v683_v62  ;;  %v2511_v62 = vld [vmem:[%s4413_s1 + $0x2b8] sm:$0xff] }
  0x6f   : > { %2914 = vmatmul.mubr.msk.f32.gmra.mrb[22].mxu1 %vm700_vm0, %v2439_v63  ;;  %2852 = vmatprep.mubr.msk.f32.mxu0 %vm700_vm0, %v684_v0  ;;  %v2583_v63 = vld [vmem:[%s4413_s1 + $0x3b8] sm:$0xff]  ;;  %v2512_v0 = vld [vmem:[%s4413_s1 + $0x2c0] sm:$0xff] }
  0x70   : > { %2916 = vmatprep.mubr.msk.f32.mxu1 %vm700_vm0, %v2440_v1  ;;  %v2584_v1 = vld [vmem:[%s4413_s1 + $0x3c0] sm:$0xff] }
  0x72   : > { %2853 = vmatmul.mubr.msk.f32.gmra.mrb[24].mxu0 %vm700_vm0, %v685_v2  ;;  %v2513_v2 = vld [vmem:[%s4413_s1 + $0x2c8] sm:$0xff] }
  0x73   : > { %2917 = vmatmul.mubr.msk.f32.gmra.mrb[24].mxu1 %vm700_vm0, %v2441_v3  ;;  %2855 = vmatprep.mubr.msk.f32.mxu0 %vm700_vm0, %v686_v4  ;;  %v2585_v3 = vld [vmem:[%s4413_s1 + $0x3c8] sm:$0xff]  ;;  %v2514_v4 = vld [vmem:[%s4413_s1 + $0x2d0] sm:$0xff] }
  0x74   : > { %2919 = vmatprep.mubr.msk.f32.mxu1 %vm700_vm0, %v2442_v5  ;;  %v2586_v5 = vld [vmem:[%s4413_s1 + $0x3d0] sm:$0xff] }
  0x76   : > { %2856 = vmatmul.mubr.msk.f32.gmra.mrb[26].mxu0 %vm700_vm0, %v687_v6  ;;  %v2515_v6 = vld [vmem:[%s4413_s1 + $0x2d8] sm:$0xff] }
  0x77   : > { %2920 = vmatmul.mubr.msk.f32.gmra.mrb[26].mxu1 %vm700_vm0, %v2443_v7  ;;  %2858 = vmatprep.mubr.msk.f32.mxu0 %vm700_vm0, %v688_v8  ;;  %v2587_v7 = vld [vmem:[%s4413_s1 + $0x3d8] sm:$0xff]  ;;  %v2516_v8 = vld [vmem:[%s4413_s1 + $0x2e0] sm:$0xff] }
  0x78   : > { %2922 = vmatprep.mubr.msk.f32.mxu1 %vm700_vm0, %v2444_v9  ;;  %v2588_v9 = vld [vmem:[%s4413_s1 + $0x3e0] sm:$0xff] }
  0x7a   : > { %2859 = vmatmul.mubr.msk.f32.gmra.mrb[28].mxu0 %vm700_vm0, %v689_v10  ;;  %v2517_v10 = vld [vmem:[%s4413_s1 + $0x2e8] sm:$0xff] }
  0x7b   : > { %2923 = vmatmul.mubr.msk.f32.gmra.mrb[28].mxu1 %vm700_vm0, %v2445_v11  ;;  %2861 = vmatprep.mubr.msk.f32.mxu0 %vm700_vm0, %v690_v12  ;;  %v2589_v11 = vld [vmem:[%s4413_s1 + $0x3e8] sm:$0xff]  ;;  %v2518_v12 = vld [vmem:[%s4413_s1 + $0x2f0] sm:$0xff] }
  0x7c   : > { %2925 = vmatprep.mubr.msk.f32.mxu1 %vm700_vm0, %v2446_v13  ;;  %v2590_v13 = vld [vmem:[%s4413_s1 + $0x3f0] sm:$0xff] }
  0x7e   : > { %2862 = vmatmul.mubr.msk.f32.gmra.mrb[30].mxu0 %vm700_vm0, %v691_v14  ;;  %v2519_v14 = vld [vmem:[%s4413_s1 + $0x2f8] sm:$0xff] }
  0x7f   : > { %2926 = vmatmul.mubr.msk.f32.gmra.mrb[30].mxu1 %vm700_vm0, %v2447_v15  ;;  %2944 = vmatprep.mubr.msk.f32.mxu0 %vm700_vm0, %v2488_v16  ;;  %v2591_v15 = vld [vmem:[%s4413_s1 + $0x3f8] sm:$0xff]  ;;  %v404_v16 = vld [vmem:[%s3968_s23] sm:$0xff] }
  0x80   : > { %3008 = vmatprep.mubr.msk.f32.mxu1 %vm700_vm0, %v2560_v17  ;;  %v405_v17 = vld [vmem:[%s3968_s23 + $0x8] sm:$0xff]  ;;  %532 = vst [vmem:[%s3976_s26] sm:$0xff] %v404_v16  ;;  %v452_v16 = vld [vmem:[%s3968_s23 + $0x180] sm:$0xff] }
  0x81   : > { %533 = vst [vmem:[%s3976_s26 + $0x8] sm:$0xff] %v405_v17  ;;  %v453_v17 = vld [vmem:[%s3968_s23 + $0x188] sm:$0xff]  ;;  %580 = vst [vmem:[%s3976_s26 + $0x300] sm:$0xff] %v452_v16  ;;  %v500_v16 = vld [vmem:[%s3968_s23 + $0x300] sm:$0xff] }
  0x82   : > { %2945 = vmatmul.mubr.msk.f32.vlgmr.msra.gmra.mrb[32].mxu0 %vm700_vm0, %v2489_v18  ;;  %v406_v18 = vld [vmem:[%s3968_s23 + $0x10] sm:$0xff]  ;;  %581 = vst [vmem:[%s3976_s26 + $0x308] sm:$0xff] %v453_v17  ;;  %v501_v17 = vld [vmem:[%s3968_s23 + $0x308] sm:$0xff]  ;;  %628 = vst [vmem:[%s3976_s26 + $0x600] sm:$0xff] %v500_v16 }
  0x83   : > { %3009 = vmatmul.mubr.msk.f32.vlgmr.msra.gmra.mrb[32].mxu1 %vm700_vm0, %v2561_v19  ;;  %2947 = vmatprep.mubr.msk.f32.mxu0 %vm700_vm0, %v2490_v20  ;;  %v407_v19 = vld [vmem:[%s3968_s23 + $0x18] sm:$0xff]  ;;  %v408_v20 = vld [vmem:[%s3968_s23 + $0x20] sm:$0xff]  ;;  %534 = vst [vmem:[%s3976_s26 + $0x10] sm:$0xff] %v406_v18  ;;  %v454_v18 = vld [vmem:[%s3968_s23 + $0x190] sm:$0xff] }
  0x84   : > { %3011 = vmatprep.mubr.msk.f32.mxu1 %vm700_vm0, %v2562_v21  ;;  %v409_v21 = vld [vmem:[%s3968_s23 + $0x28] sm:$0xff]  ;;  %535 = vst [vmem:[%s3976_s26 + $0x18] sm:$0xff] %v407_v19  ;;  %536 = vst [vmem:[%s3976_s26 + $0x40] sm:$0xff] %v408_v20  ;;  %v455_v19 = vld [vmem:[%s3968_s23 + $0x198] sm:$0xff] }
  0x85   : > { %537 = vst [vmem:[%s3976_s26 + $0x48] sm:$0xff] %v409_v21  ;;  %v456_v20 = vld [vmem:[%s3968_s23 + $0x1a0] sm:$0xff]  ;;  %v457_v21 = vld [vmem:[%s3968_s23 + $0x1a8] sm:$0xff]  ;;  %582 = vst [vmem:[%s3976_s26 + $0x310] sm:$0xff] %v454_v18 }
  0x86   : > { %2948 = vmatmul.mubr.msk.f32.gmra.mrb[34].mxu0 %vm700_vm0, %v2491_v22  ;;  %583 = vst [vmem:[%s3976_s26 + $0x318] sm:$0xff] %v455_v19  ;;  %584 = vst [vmem:[%s3976_s26 + $0x340] sm:$0xff] %v456_v20  ;;  %v502_v18 = vld [vmem:[%s3968_s23 + $0x310] sm:$0xff]  ;;  %v503_v19 = vld [vmem:[%s3968_s23 + $0x318] sm:$0xff] }
  0x87   : > { %3012 = vmatmul.mubr.msk.f32.gmra.mrb[34].mxu1 %vm700_vm0, %v2563_v23  ;;  %2950 = vmatprep.mubr.msk.f32.mxu0 %vm700_vm0, %v2492_v24  ;;  %v410_v23 = vld [vmem:[%s3968_s23 + $0x30] sm:$0xff]  ;;  %v411_v24 = vld [vmem:[%s3968_s23 + $0x38] sm:$0xff]  ;;  %585 = vst [vmem:[%s3976_s26 + $0x348] sm:$0xff] %v457_v21  ;;  %v504_v20 = vld [vmem:[%s3968_s23 + $0x320] sm:$0xff] }
  0x88   : > { %3014 = vmatprep.mubr.msk.f32.mxu1 %vm700_vm0, %v2564_v25  ;;  %v412_v25 = vld [vmem:[%s3968_s23 + $0x40] sm:$0xff]  ;;  %538 = vst [vmem:[%s3976_s26 + $0x50] sm:$0xff] %v410_v23  ;;  %539 = vst [vmem:[%s3976_s26 + $0x58] sm:$0xff] %v411_v24  ;;  %v458_v23 = vld [vmem:[%s3968_s23 + $0x1b0] sm:$0xff] }
  0x89   : > { %540 = vst [vmem:[%s3976_s26 + $0x80] sm:$0xff] %v412_v25  ;;  %v459_v24 = vld [vmem:[%s3968_s23 + $0x1b8] sm:$0xff]  ;;  %v460_v25 = vld [vmem:[%s3968_s23 + $0x1c0] sm:$0xff]  ;;  %586 = vst [vmem:[%s3976_s26 + $0x350] sm:$0xff] %v458_v23 }
  0x8a   : > { %2951 = vmatmul.mubr.msk.f32.gmra.mrb[36].mxu0 %vm700_vm0, %v2493_v26  ;;  %587 = vst [vmem:[%s3976_s26 + $0x358] sm:$0xff] %v459_v24  ;;  %588 = vst [vmem:[%s3976_s26 + $0x380] sm:$0xff] %v460_v25  ;;  %v505_v21 = vld [vmem:[%s3968_s23 + $0x328] sm:$0xff]  ;;  %v506_v23 = vld [vmem:[%s3968_s23 + $0x330] sm:$0xff] }
  0x8b   : > { %3015 = vmatmul.mubr.msk.f32.gmra.mrb[36].mxu1 %vm700_vm0, %v2565_v27  ;;  %2953 = vmatprep.mubr.msk.f32.mxu0 %vm700_vm0, %v2494_v28  ;;  %v413_v28 = vld [vmem:[%s3968_s23 + $0x48] sm:$0xff]  ;;  %629 = vst [vmem:[%s3976_s26 + $0x608] sm:$0xff] %v501_v17  ;;  %630 = vst [vmem:[%s3976_s26 + $0x610] sm:$0xff] %v502_v18  ;;  %v507_v24 = vld [vmem:[%s3968_s23 + $0x338] sm:$0xff] }
  0x8c   : > { %3017 = vmatprep.mubr.msk.f32.mxu1 %vm700_vm0, %v2566_v29  ;;  %v414_v29 = vld [vmem:[%s3968_s23 + $0x50] sm:$0xff]  ;;  %541 = vst [vmem:[%s3976_s26 + $0x88] sm:$0xff] %v413_v28  ;;  %v461_v28 = vld [vmem:[%s3968_s23 + $0x1c8] sm:$0xff]  ;;  %v508_v25 = vld [vmem:[%s3968_s23 + $0x340] sm:$0xff] }
  0x8d   : > { %542 = vst [vmem:[%s3976_s26 + $0x90] sm:$0xff] %v414_v29  ;;  %v462_v29 = vld [vmem:[%s3968_s23 + $0x1d0] sm:$0xff]  ;;  %589 = vst [vmem:[%s3976_s26 + $0x388] sm:$0xff] %v461_v28  ;;  %v509_v28 = vld [vmem:[%s3968_s23 + $0x348] sm:$0xff] }
  0x8e   : > { %2954 = vmatmul.mubr.msk.f32.gmra.mrb[38].mxu0 %vm700_vm0, %v2495_v30  ;;  %v415_v30 = vld [vmem:[%s3968_s23 + $0x58] sm:$0xff]  ;;  %590 = vst [vmem:[%s3976_s26 + $0x390] sm:$0xff] %v462_v29  ;;  %631 = vst [vmem:[%s3976_s26 + $0x618] sm:$0xff] %v503_v19  ;;  %v510_v29 = vld [vmem:[%s3968_s23 + $0x350] sm:$0xff] }
  0x8f   : > { %3018 = vmatmul.mubr.msk.f32.gmra.mrb[38].mxu1 %vm700_vm0, %v2567_v31  ;;  %2956 = vmatprep.mubr.msk.f32.mxu0 %vm700_vm0, %v2496_v32  ;;  %v416_v32 = vld [vmem:[%s3968_s23 + $0x60] sm:$0xff]  ;;  %543 = vst [vmem:[%s3976_s26 + $0x98] sm:$0xff] %v415_v30  ;;  %v463_v30 = vld [vmem:[%s3968_s23 + $0x1d8] sm:$0xff]  ;;  %632 = vst [vmem:[%s3976_s26 + $0x640] sm:$0xff] %v504_v20 }
  0x90   : > { %3020 = vmatprep.mubr.msk.f32.mxu1 %vm700_vm0, %v2568_v33  ;;  %v417_v33 = vld [vmem:[%s3968_s23 + $0x68] sm:$0xff]  ;;  %544 = vst [vmem:[%s3976_s26 + $0xc0] sm:$0xff] %v416_v32  ;;  %v464_v32 = vld [vmem:[%s3968_s23 + $0x1e0] sm:$0xff]  ;;  %591 = vst [vmem:[%s3976_s26 + $0x398] sm:$0xff] %v463_v30 }
  0x91   : > { %545 = vst [vmem:[%s3976_s26 + $0xc8] sm:$0xff] %v417_v33  ;;  %v465_v33 = vld [vmem:[%s3968_s23 + $0x1e8] sm:$0xff]  ;;  %592 = vst [vmem:[%s3976_s26 + $0x3c0] sm:$0xff] %v464_v32  ;;  %v511_v30 = vld [vmem:[%s3968_s23 + $0x358] sm:$0xff] }
  0x92   : > { %2957 = vmatmul.mubr.msk.f32.gmra.mrb[40].mxu0 %vm700_vm0, %v2497_v34  ;;  %v418_v34 = vld [vmem:[%s3968_s23 + $0x70] sm:$0xff]  ;;  %593 = vst [vmem:[%s3976_s26 + $0x3c8] sm:$0xff] %v465_v33  ;;  %633 = vst [vmem:[%s3976_s26 + $0x648] sm:$0xff] %v505_v21  ;;  %v512_v32 = vld [vmem:[%s3968_s23 + $0x360] sm:$0xff] }
  0x93   : > { %3021 = vmatmul.mubr.msk.f32.gmra.mrb[40].mxu1 %vm700_vm0, %v2569_v35  ;;  %2959 = vmatprep.mubr.msk.f32.mxu0 %vm700_vm0, %v2498_v36  ;;  %v419_v35 = vld [vmem:[%s3968_s23 + $0x78] sm:$0xff]  ;;  %v420_v36 = vld [vmem:[%s3968_s23 + $0x80] sm:$0xff]  ;;  %546 = vst [vmem:[%s3976_s26 + $0xd0] sm:$0xff] %v418_v34  ;;  %v466_v34 = vld [vmem:[%s3968_s23 + $0x1f0] sm:$0xff] }
  0x94   : > { %3023 = vmatprep.mubr.msk.f32.mxu1 %vm700_vm0, %v2570_v37  ;;  %v421_v37 = vld [vmem:[%s3968_s23 + $0x88] sm:$0xff]  ;;  %547 = vst [vmem:[%s3976_s26 + $0xd8] sm:$0xff] %v419_v35  ;;  %548 = vst [vmem:[%s3976_s26 + $0x100] sm:$0xff] %v420_v36  ;;  %v467_v35 = vld [vmem:[%s3968_s23 + $0x1f8] sm:$0xff] }
  0x95   : > { %549 = vst [vmem:[%s3976_s26 + $0x108] sm:$0xff] %v421_v37  ;;  %v468_v36 = vld [vmem:[%s3968_s23 + $0x200] sm:$0xff]  ;;  %v469_v37 = vld [vmem:[%s3968_s23 + $0x208] sm:$0xff]  ;;  %594 = vst [vmem:[%s3976_s26 + $0x3d0] sm:$0xff] %v466_v34 }
  0x96   : > { %2960 = vmatmul.mubr.msk.f32.gmra.mrb[42].mxu0 %vm700_vm0, %v2499_v38  ;;  %595 = vst [vmem:[%s3976_s26 + $0x3d8] sm:$0xff] %v467_v35  ;;  %596 = vst [vmem:[%s3976_s26 + $0x400] sm:$0xff] %v468_v36  ;;  %v513_v33 = vld [vmem:[%s3968_s23 + $0x368] sm:$0xff]  ;;  %v514_v34 = vld [vmem:[%s3968_s23 + $0x370] sm:$0xff] }
  0x97   : > { %3024 = vmatmul.mubr.msk.f32.gmra.mrb[42].mxu1 %vm700_vm0, %v2571_v39  ;;  %2962 = vmatprep.mubr.msk.f32.mxu0 %vm700_vm0, %v2500_v40  ;;  %v422_v39 = vld [vmem:[%s3968_s23 + $0x90] sm:$0xff]  ;;  %v423_v40 = vld [vmem:[%s3968_s23 + $0x98] sm:$0xff]  ;;  %597 = vst [vmem:[%s3976_s26 + $0x408] sm:$0xff] %v469_v37  ;;  %634 = vst [vmem:[%s3976_s26 + $0x650] sm:$0xff] %v506_v23 }
  0x98   : > { %3026 = vmatprep.mubr.msk.f32.mxu1 %vm700_vm0, %v2572_v41  ;;  %v424_v41 = vld [vmem:[%s3968_s23 + $0xa0] sm:$0xff]  ;;  %550 = vst [vmem:[%s3976_s26 + $0x110] sm:$0xff] %v422_v39  ;;  %551 = vst [vmem:[%s3976_s26 + $0x118] sm:$0xff] %v423_v40  ;;  %v470_v39 = vld [vmem:[%s3968_s23 + $0x210] sm:$0xff] }
  0x99   : > { %552 = vst [vmem:[%s3976_s26 + $0x140] sm:$0xff] %v424_v41  ;;  %v471_v40 = vld [vmem:[%s3968_s23 + $0x218] sm:$0xff]  ;;  %v472_v41 = vld [vmem:[%s3968_s23 + $0x220] sm:$0xff]  ;;  %598 = vst [vmem:[%s3976_s26 + $0x410] sm:$0xff] %v470_v39 }
  0x9a   : > { %2963 = vmatmul.mubr.msk.f32.gmra.mrb[44].mxu0 %vm700_vm0, %v2501_v42  ;;  %599 = vst [vmem:[%s3976_s26 + $0x418] sm:$0xff] %v471_v40  ;;  %600 = vst [vmem:[%s3976_s26 + $0x440] sm:$0xff] %v472_v41  ;;  %v515_v35 = vld [vmem:[%s3968_s23 + $0x378] sm:$0xff]  ;;  %v516_v36 = vld [vmem:[%s3968_s23 + $0x380] sm:$0xff] }
  0x9b   : > { %3027 = vmatmul.mubr.msk.f32.gmra.mrb[44].mxu1 %vm700_vm0, %v2573_v43  ;;  %2965 = vmatprep.mubr.msk.f32.mxu0 %vm700_vm0, %v2502_v44  ;;  %v425_v44 = vld [vmem:[%s3968_s23 + $0xa8] sm:$0xff]  ;;  %635 = vst [vmem:[%s3976_s26 + $0x658] sm:$0xff] %v507_v24  ;;  %636 = vst [vmem:[%s3976_s26 + $0x680] sm:$0xff] %v508_v25  ;;  %v518_v39 = vld [vmem:[%s3968_s23 + $0x390] sm:$0xff] }
  0x9c   : > { %3029 = vmatprep.mubr.msk.f32.mxu1 %vm700_vm0, %v2574_v45  ;;  %v426_v45 = vld [vmem:[%s3968_s23 + $0xb0] sm:$0xff]  ;;  %553 = vst [vmem:[%s3976_s26 + $0x148] sm:$0xff] %v425_v44  ;;  %v473_v44 = vld [vmem:[%s3968_s23 + $0x228] sm:$0xff]  ;;  %637 = vst [vmem:[%s3976_s26 + $0x688] sm:$0xff] %v509_v28 }
  0x9d   : > { %554 = vst [vmem:[%s3976_s26 + $0x150] sm:$0xff] %v426_v45  ;;  %v474_v45 = vld [vmem:[%s3968_s23 + $0x230] sm:$0xff]  ;;  %601 = vst [vmem:[%s3976_s26 + $0x448] sm:$0xff] %v473_v44  ;;  %v517_v37 = vld [vmem:[%s3968_s23 + $0x388] sm:$0xff] }
  0x9e   : > { %2966 = vmatmul.mubr.msk.f32.gmra.mrb[46].mxu0 %vm700_vm0, %v2503_v46  ;;  %v427_v46 = vld [vmem:[%s3968_s23 + $0xb8] sm:$0xff]  ;;  %602 = vst [vmem:[%s3976_s26 + $0x450] sm:$0xff] %v474_v45  ;;  %638 = vst [vmem:[%s3976_s26 + $0x690] sm:$0xff] %v510_v29  ;;  %v520_v41 = vld [vmem:[%s3968_s23 + $0x3a0] sm:$0xff] }
  0x9f   : > { %3030 = vmatmul.mubr.msk.f32.gmra.mrb[46].mxu1 %vm700_vm0, %v2575_v47  ;;  %2968 = vmatprep.mubr.msk.f32.mxu0 %vm700_vm0, %v2504_v48  ;;  %v428_v48 = vld [vmem:[%s3968_s23 + $0xc0] sm:$0xff]  ;;  %555 = vst [vmem:[%s3976_s26 + $0x158] sm:$0xff] %v427_v46  ;;  %v475_v46 = vld [vmem:[%s3968_s23 + $0x238] sm:$0xff]  ;;  %639 = vst [vmem:[%s3976_s26 + $0x698] sm:$0xff] %v511_v30 }
  0xa0   : > { %3032 = vmatprep.mubr.msk.f32.mxu1 %vm700_vm0, %v2576_v49  ;;  %v429_v49 = vld [vmem:[%s3968_s23 + $0xc8] sm:$0xff]  ;;  %556 = vst [vmem:[%s3976_s26 + $0x180] sm:$0xff] %v428_v48  ;;  %v476_v48 = vld [vmem:[%s3968_s23 + $0x240] sm:$0xff]  ;;  %603 = vst [vmem:[%s3976_s26 + $0x458] sm:$0xff] %v475_v46 }
  0xa1   : > { %557 = vst [vmem:[%s3976_s26 + $0x188] sm:$0xff] %v429_v49  ;;  %v477_v49 = vld [vmem:[%s3968_s23 + $0x248] sm:$0xff]  ;;  %604 = vst [vmem:[%s3976_s26 + $0x480] sm:$0xff] %v476_v48  ;;  %v519_v40 = vld [vmem:[%s3968_s23 + $0x398] sm:$0xff] }
  0xa2   : > { %2969 = vmatmul.mubr.msk.f32.gmra.mrb[48].mxu0 %vm700_vm0, %v2505_v50  ;;  %v430_v50 = vld [vmem:[%s3968_s23 + $0xd0] sm:$0xff]  ;;  %605 = vst [vmem:[%s3976_s26 + $0x488] sm:$0xff] %v477_v49  ;;  %640 = vst [vmem:[%s3976_s26 + $0x6c0] sm:$0xff] %v512_v32  ;;  %v521_v44 = vld [vmem:[%s3968_s23 + $0x3a8] sm:$0xff] }
  0xa3   : > { %3033 = vmatmul.mubr.msk.f32.gmra.mrb[48].mxu1 %vm700_vm0, %v2577_v51  ;;  %2971 = vmatprep.mubr.msk.f32.mxu0 %vm700_vm0, %v2506_v52  ;;  %v431_v51 = vld [vmem:[%s3968_s23 + $0xd8] sm:$0xff]  ;;  %v432_v52 = vld [vmem:[%s3968_s23 + $0xe0] sm:$0xff]  ;;  %558 = vst [vmem:[%s3976_s26 + $0x190] sm:$0xff] %v430_v50  ;;  %v478_v50 = vld [vmem:[%s3968_s23 + $0x250] sm:$0xff] }
  0xa4   : > { %3035 = vmatprep.mubr.msk.f32.mxu1 %vm700_vm0, %v2578_v53  ;;  %v433_v53 = vld [vmem:[%s3968_s23 + $0xe8] sm:$0xff]  ;;  %559 = vst [vmem:[%s3976_s26 + $0x198] sm:$0xff] %v431_v51  ;;  %560 = vst [vmem:[%s3976_s26 + $0x1c0] sm:$0xff] %v432_v52  ;;  %v479_v51 = vld [vmem:[%s3968_s23 + $0x258] sm:$0xff] }
  0xa5   : > { %561 = vst [vmem:[%s3976_s26 + $0x1c8] sm:$0xff] %v433_v53  ;;  %v480_v52 = vld [vmem:[%s3968_s23 + $0x260] sm:$0xff]  ;;  %v481_v53 = vld [vmem:[%s3968_s23 + $0x268] sm:$0xff]  ;;  %606 = vst [vmem:[%s3976_s26 + $0x490] sm:$0xff] %v478_v50 }
  0xa6   : > { %2972 = vmatmul.mubr.msk.f32.gmra.mrb[50].mxu0 %vm700_vm0, %v2507_v54  ;;  %607 = vst [vmem:[%s3976_s26 + $0x498] sm:$0xff] %v479_v51  ;;  %608 = vst [vmem:[%s3976_s26 + $0x4c0] sm:$0xff] %v480_v52  ;;  %v522_v45 = vld [vmem:[%s3968_s23 + $0x3b0] sm:$0xff]  ;;  %v523_v46 = vld [vmem:[%s3968_s23 + $0x3b8] sm:$0xff] }
  0xa7   : > { %3036 = vmatmul.mubr.msk.f32.gmra.mrb[50].mxu1 %vm700_vm0, %v2579_v55  ;;  %2974 = vmatprep.mubr.msk.f32.mxu0 %vm700_vm0, %v2508_v56  ;;  %v434_v55 = vld [vmem:[%s3968_s23 + $0xf0] sm:$0xff]  ;;  %v435_v56 = vld [vmem:[%s3968_s23 + $0xf8] sm:$0xff]  ;;  %609 = vst [vmem:[%s3976_s26 + $0x4c8] sm:$0xff] %v481_v53  ;;  %641 = vst [vmem:[%s3976_s26 + $0x6c8] sm:$0xff] %v513_v33 }
  0xa8   : > { %3038 = vmatprep.mubr.msk.f32.mxu1 %vm700_vm0, %v2580_v57  ;;  %v436_v57 = vld [vmem:[%s3968_s23 + $0x100] sm:$0xff]  ;;  %562 = vst [vmem:[%s3976_s26 + $0x1d0] sm:$0xff] %v434_v55  ;;  %563 = vst [vmem:[%s3976_s26 + $0x1d8] sm:$0xff] %v435_v56  ;;  %v482_v55 = vld [vmem:[%s3968_s23 + $0x270] sm:$0xff] }
  0xa9   : > { %564 = vst [vmem:[%s3976_s26 + $0x200] sm:$0xff] %v436_v57  ;;  %v483_v56 = vld [vmem:[%s3968_s23 + $0x278] sm:$0xff]  ;;  %v484_v57 = vld [vmem:[%s3968_s23 + $0x280] sm:$0xff]  ;;  %610 = vst [vmem:[%s3976_s26 + $0x4d0] sm:$0xff] %v482_v55 }
  0xaa   : > { %2975 = vmatmul.mubr.msk.f32.gmra.mrb[52].mxu0 %vm700_vm0, %v2509_v58  ;;  %611 = vst [vmem:[%s3976_s26 + $0x4d8] sm:$0xff] %v483_v56  ;;  %612 = vst [vmem:[%s3976_s26 + $0x500] sm:$0xff] %v484_v57  ;;  %v524_v48 = vld [vmem:[%s3968_s23 + $0x3c0] sm:$0xff]  ;;  %v525_v49 = vld [vmem:[%s3968_s23 + $0x3c8] sm:$0xff] }
  0xab   : > { %3039 = vmatmul.mubr.msk.f32.gmra.mrb[52].mxu1 %vm700_vm0, %v2581_v59  ;;  %2977 = vmatprep.mubr.msk.f32.mxu0 %vm700_vm0, %v2510_v60  ;;  %v437_v60 = vld [vmem:[%s3968_s23 + $0x108] sm:$0xff]  ;;  %642 = vst [vmem:[%s3976_s26 + $0x6d0] sm:$0xff] %v514_v34  ;;  %643 = vst [vmem:[%s3976_s26 + $0x6d8] sm:$0xff] %v515_v35  ;;  %v526_v50 = vld [vmem:[%s3968_s23 + $0x3d0] sm:$0xff] }
  0xac   : > { %3041 = vmatprep.mubr.msk.f32.mxu1 %vm700_vm0, %v2582_v61  ;;  %v438_v61 = vld [vmem:[%s3968_s23 + $0x110] sm:$0xff]  ;;  %565 = vst [vmem:[%s3976_s26 + $0x208] sm:$0xff] %v437_v60  ;;  %v485_v60 = vld [vmem:[%s3968_s23 + $0x288] sm:$0xff]  ;;  %644 = vst [vmem:[%s3976_s26 + $0x700] sm:$0xff] %v516_v36 }
  0xad   : > { %566 = vst [vmem:[%s3976_s26 + $0x210] sm:$0xff] %v438_v61  ;;  %v486_v61 = vld [vmem:[%s3968_s23 + $0x290] sm:$0xff]  ;;  %613 = vst [vmem:[%s3976_s26 + $0x508] sm:$0xff] %v485_v60  ;;  %v527_v51 = vld [vmem:[%s3968_s23 + $0x3d8] sm:$0xff] }
  0xae   : > { %2978 = vmatmul.mubr.msk.f32.gmra.mrb[54].mxu0 %vm700_vm0, %v2511_v62  ;;  %v439_v62 = vld [vmem:[%s3968_s23 + $0x118] sm:$0xff]  ;;  %614 = vst [vmem:[%s3976_s26 + $0x510] sm:$0xff] %v486_v61  ;;  %645 = vst [vmem:[%s3976_s26 + $0x708] sm:$0xff] %v517_v37  ;;  %v528_v52 = vld [vmem:[%s3968_s23 + $0x3e0] sm:$0xff] }
  0xaf   : > { %3042 = vmatmul.mubr.msk.f32.gmra.mrb[54].mxu1 %vm700_vm0, %v2583_v63  ;;  %2980 = vmatprep.mubr.msk.f32.mxu0 %vm700_vm0, %v2512_v0  ;;  %v440_v0 = vld [vmem:[%s3968_s23 + $0x120] sm:$0xff]  ;;  %567 = vst [vmem:[%s3976_s26 + $0x218] sm:$0xff] %v439_v62  ;;  %v487_v62 = vld [vmem:[%s3968_s23 + $0x298] sm:$0xff]  ;;  %646 = vst [vmem:[%s3976_s26 + $0x710] sm:$0xff] %v518_v39 }
  0xb0   : > { %3044 = vmatprep.mubr.msk.f32.mxu1 %vm700_vm0, %v2584_v1  ;;  %v441_v1 = vld [vmem:[%s3968_s23 + $0x128] sm:$0xff]  ;;  %568 = vst [vmem:[%s3976_s26 + $0x240] sm:$0xff] %v440_v0  ;;  %v488_v0 = vld [vmem:[%s3968_s23 + $0x2a0] sm:$0xff]  ;;  %615 = vst [vmem:[%s3976_s26 + $0x518] sm:$0xff] %v487_v62 }
  0xb1   : > { %569 = vst [vmem:[%s3976_s26 + $0x248] sm:$0xff] %v441_v1  ;;  %v489_v1 = vld [vmem:[%s3968_s23 + $0x2a8] sm:$0xff]  ;;  %616 = vst [vmem:[%s3976_s26 + $0x540] sm:$0xff] %v488_v0  ;;  %v530_v55 = vld [vmem:[%s3968_s23 + $0x3f0] sm:$0xff] }
  0xb2   : > { %2981 = vmatmul.mubr.msk.f32.gmra.mrb[56].mxu0 %vm700_vm0, %v2513_v2  ;;  %v442_v2 = vld [vmem:[%s3968_s23 + $0x130] sm:$0xff]  ;;  %617 = vst [vmem:[%s3976_s26 + $0x548] sm:$0xff] %v489_v1  ;;  %647 = vst [vmem:[%s3976_s26 + $0x718] sm:$0xff] %v519_v40  ;;  %v529_v53 = vld [vmem:[%s3968_s23 + $0x3e8] sm:$0xff] }
  0xb3   : > { %3045 = vmatmul.mubr.msk.f32.gmra.mrb[56].mxu1 %vm700_vm0, %v2585_v3  ;;  %2983 = vmatprep.mubr.msk.f32.mxu0 %vm700_vm0, %v2514_v4  ;;  %v443_v3 = vld [vmem:[%s3968_s23 + $0x138] sm:$0xff]  ;;  %v444_v4 = vld [vmem:[%s3968_s23 + $0x140] sm:$0xff]  ;;  %570 = vst [vmem:[%s3976_s26 + $0x250] sm:$0xff] %v442_v2  ;;  %v490_v2 = vld [vmem:[%s3968_s23 + $0x2b0] sm:$0xff] }
  0xb4   : > { %3047 = vmatprep.mubr.msk.f32.mxu1 %vm700_vm0, %v2586_v5  ;;  %v445_v5 = vld [vmem:[%s3968_s23 + $0x148] sm:$0xff]  ;;  %571 = vst [vmem:[%s3976_s26 + $0x258] sm:$0xff] %v443_v3  ;;  %572 = vst [vmem:[%s3976_s26 + $0x280] sm:$0xff] %v444_v4  ;;  %v491_v3 = vld [vmem:[%s3968_s23 + $0x2b8] sm:$0xff] }
  0xb5   : > { %573 = vst [vmem:[%s3976_s26 + $0x288] sm:$0xff] %v445_v5  ;;  %v492_v4 = vld [vmem:[%s3968_s23 + $0x2c0] sm:$0xff]  ;;  %v493_v5 = vld [vmem:[%s3968_s23 + $0x2c8] sm:$0xff]  ;;  %618 = vst [vmem:[%s3976_s26 + $0x550] sm:$0xff] %v490_v2 }
  0xb6   : > { %2984 = vmatmul.mubr.msk.f32.gmra.mrb[58].mxu0 %vm700_vm0, %v2515_v6  ;;  %619 = vst [vmem:[%s3976_s26 + $0x558] sm:$0xff] %v491_v3  ;;  %620 = vst [vmem:[%s3976_s26 + $0x580] sm:$0xff] %v492_v4  ;;  %v531_v56 = vld [vmem:[%s3968_s23 + $0x3f8] sm:$0xff] }
  0xb7   : > { %3048 = vmatmul.mubr.msk.f32.gmra.mrb[58].mxu1 %vm700_vm0, %v2587_v7  ;;  %2986 = vmatprep.mubr.msk.f32.mxu0 %vm700_vm0, %v2516_v8  ;;  %v446_v7 = vld [vmem:[%s3968_s23 + $0x150] sm:$0xff]  ;;  %v447_v8 = vld [vmem:[%s3968_s23 + $0x158] sm:$0xff]  ;;  %621 = vst [vmem:[%s3976_s26 + $0x588] sm:$0xff] %v493_v5  ;;  %648 = vst [vmem:[%s3976_s26 + $0x740] sm:$0xff] %v520_v41 }
  0xb8   : > { %3050 = vmatprep.mubr.msk.f32.mxu1 %vm700_vm0, %v2588_v9  ;;  %v448_v9 = vld [vmem:[%s3968_s23 + $0x160] sm:$0xff]  ;;  %574 = vst [vmem:[%s3976_s26 + $0x290] sm:$0xff] %v446_v7  ;;  %575 = vst [vmem:[%s3976_s26 + $0x298] sm:$0xff] %v447_v8  ;;  %v494_v7 = vld [vmem:[%s3968_s23 + $0x2d0] sm:$0xff] }
  0xb9   : > { %576 = vst [vmem:[%s3976_s26 + $0x2c0] sm:$0xff] %v448_v9  ;;  %v495_v8 = vld [vmem:[%s3968_s23 + $0x2d8] sm:$0xff]  ;;  %v496_v9 = vld [vmem:[%s3968_s23 + $0x2e0] sm:$0xff]  ;;  %622 = vst [vmem:[%s3976_s26 + $0x590] sm:$0xff] %v494_v7 }
  0xba   : > { %2987 = vmatmul.mubr.msk.f32.gmra.mrb[60].mxu0 %vm700_vm0, %v2517_v10  ;;  %623 = vst [vmem:[%s3976_s26 + $0x598] sm:$0xff] %v495_v8  ;;  %624 = vst [vmem:[%s3976_s26 + $0x5c0] sm:$0xff] %v496_v9 }
  0xbb   : > { %3051 = vmatmul.mubr.msk.f32.gmra.mrb[60].mxu1 %vm700_vm0, %v2589_v11  ;;  %2989 = vmatprep.mubr.msk.f32.mxu0 %vm700_vm0, %v2518_v12  ;;  %v449_v12 = vld [vmem:[%s3968_s23 + $0x168] sm:$0xff]  ;;  %649 = vst [vmem:[%s3976_s26 + $0x748] sm:$0xff] %v521_v44  ;;  %650 = vst [vmem:[%s3976_s26 + $0x750] sm:$0xff] %v522_v45 }
  0xbc   : > { %3053 = vmatprep.mubr.msk.f32.mxu1 %vm700_vm0, %v2590_v13  ;;  %v450_v13 = vld [vmem:[%s3968_s23 + $0x170] sm:$0xff]  ;;  %577 = vst [vmem:[%s3976_s26 + $0x2c8] sm:$0xff] %v449_v12  ;;  %v497_v12 = vld [vmem:[%s3968_s23 + $0x2e8] sm:$0xff]  ;;  %651 = vst [vmem:[%s3976_s26 + $0x758] sm:$0xff] %v523_v46 }
  0xbd   : > { %578 = vst [vmem:[%s3976_s26 + $0x2d0] sm:$0xff] %v450_v13  ;;  %v498_v13 = vld [vmem:[%s3968_s23 + $0x2f0] sm:$0xff]  ;;  %625 = vst [vmem:[%s3976_s26 + $0x5c8] sm:$0xff] %v497_v12 }
  0xbe   : > { %2990 = vmatmul.mubr.msk.f32.gmra.mrb[62].mxu0 %vm700_vm0, %v2519_v14  ;;  %v451_v14 = vld [vmem:[%s3968_s23 + $0x178] sm:$0xff]  ;;  %626 = vst [vmem:[%s3976_s26 + $0x5d0] sm:$0xff] %v498_v13  ;;  %652 = vst [vmem:[%s3976_s26 + $0x780] sm:$0xff] %v524_v48 }
  0xbf   : > { %3054 = vmatmul.mubr.msk.f32.gmra.mrb[62].mxu1 %vm700_vm0, %v2591_v15  ;;  %579 = vst [vmem:[%s3976_s26 + $0x2d8] sm:$0xff] %v451_v14  ;;  %v499_v14 = vld [vmem:[%s3968_s23 + $0x2f8] sm:$0xff]  ;;  %653 = vst [vmem:[%s3976_s26 + $0x788] sm:$0xff] %v525_v49 }
  0xc0   : > { %627 = vst [vmem:[%s3976_s26 + $0x5d8] sm:$0xff] %v499_v14  ;;  %654 = vst [vmem:[%s3976_s26 + $0x790] sm:$0xff] %v526_v50 }
  0xc1   : > { %655 = vst [vmem:[%s3976_s26 + $0x798] sm:$0xff] %v527_v51  ;;  %656 = vst [vmem:[%s3976_s26 + $0x7c0] sm:$0xff] %v528_v52 }
  0xc2   : > { %657 = vst [vmem:[%s3976_s26 + $0x7c8] sm:$0xff] %v529_v53  ;;  %658 = vst [vmem:[%s3976_s26 + $0x7d0] sm:$0xff] %v530_v55 }
  0xc3   : > { %659 = vst [vmem:[%s3976_s26 + $0x7d8] sm:$0xff] %v531_v56 }
 0x115   : > { %v2818_v22 = vpop.f32.mrb[0].mxu0 }
 0x116   : > { %1023 = vst [vmem:[%s3976_s26 + $0x60] sm:$0xff] %v2818_v22  ;;  %v2882_v26 = vpop.f32.mrb[0].mxu1  ;;  %v863_v27 = vpop.f32.mrb[1].mxu0 }
 0x117   : > { %1418 = vst [vmem:[%s3976_s26 + $0x68] sm:$0xff] %v2882_v26  ;;  %1022 = vst [vmem:[%s3976_s26 + $0x20] sm:$0xff] %v863_v27  ;;  %v1258_v31 = vpop.f32.mrb[1].mxu1 }
 0x118   : > { %1417 = vst [vmem:[%s3976_s26 + $0x28] sm:$0xff] %v1258_v31 }
 0x119   : > { %v2821_v38 = vpop.f32.mrb[2].mxu0 }
 0x11a   : > { %1025 = vst [vmem:[%s3976_s26 + $0xe0] sm:$0xff] %v2821_v38  ;;  %v2885_v42 = vpop.f32.mrb[2].mxu1  ;;  %v873_v43 = vpop.f32.mrb[3].mxu0 }
 0x11b   : > { %1420 = vst [vmem:[%s3976_s26 + $0xe8] sm:$0xff] %v2885_v42  ;;  %1024 = vst [vmem:[%s3976_s26 + $0xa0] sm:$0xff] %v873_v43  ;;  %v1268_v47 = vpop.f32.mrb[3].mxu1 }
 0x11c   : > { %1419 = vst [vmem:[%s3976_s26 + $0xa8] sm:$0xff] %v1268_v47 }
 0x11d   : > { %v2824_v54 = vpop.f32.mrb[4].mxu0 }
 0x11e   : > { %1027 = vst [vmem:[%s3976_s26 + $0x160] sm:$0xff] %v2824_v54  ;;  %v2888_v58 = vpop.f32.mrb[4].mxu1  ;;  %v883_v59 = vpop.f32.mrb[5].mxu0 }
 0x11f   : > { %1422 = vst [vmem:[%s3976_s26 + $0x168] sm:$0xff] %v2888_v58  ;;  %1026 = vst [vmem:[%s3976_s26 + $0x120] sm:$0xff] %v883_v59  ;;  %v1278_v63 = vpop.f32.mrb[5].mxu1 }
 0x120   : > { %1421 = vst [vmem:[%s3976_s26 + $0x128] sm:$0xff] %v1278_v63 }
 0x121   : > { %v2827_v6 = vpop.f32.mrb[6].mxu0 }
 0x122   : > { %1029 = vst [vmem:[%s3976_s26 + $0x1e0] sm:$0xff] %v2827_v6  ;;  %v2891_v10 = vpop.f32.mrb[6].mxu1  ;;  %v893_v11 = vpop.f32.mrb[7].mxu0 }
 0x123   : > { %1424 = vst [vmem:[%s3976_s26 + $0x1e8] sm:$0xff] %v2891_v10  ;;  %1028 = vst [vmem:[%s3976_s26 + $0x1a0] sm:$0xff] %v893_v11  ;;  %v1288_v15 = vpop.f32.mrb[7].mxu1 }
 0x124   : > { %1423 = vst [vmem:[%s3976_s26 + $0x1a8] sm:$0xff] %v1288_v15 }
 0x125   : > { %v2830_v22 = vpop.f32.mrb[8].mxu0 }
 0x126   : > { %1031 = vst [vmem:[%s3976_s26 + $0x260] sm:$0xff] %v2830_v22  ;;  %v2894_v26 = vpop.f32.mrb[8].mxu1  ;;  %v903_v27 = vpop.f32.mrb[9].mxu0 }
 0x127   : > { %1426 = vst [vmem:[%s3976_s26 + $0x268] sm:$0xff] %v2894_v26  ;;  %1030 = vst [vmem:[%s3976_s26 + $0x220] sm:$0xff] %v903_v27  ;;  %v1298_v31 = vpop.f32.mrb[9].mxu1 }
 0x128   : > { %1425 = vst [vmem:[%s3976_s26 + $0x228] sm:$0xff] %v1298_v31 }
 0x129   : > { %v2833_v38 = vpop.f32.mrb[10].mxu0 }
 0x12a   : > { %1033 = vst [vmem:[%s3976_s26 + $0x2e0] sm:$0xff] %v2833_v38  ;;  %v2897_v42 = vpop.f32.mrb[10].mxu1  ;;  %v913_v43 = vpop.f32.mrb[11].mxu0 }
 0x12b   : > { %1428 = vst [vmem:[%s3976_s26 + $0x2e8] sm:$0xff] %v2897_v42  ;;  %1032 = vst [vmem:[%s3976_s26 + $0x2a0] sm:$0xff] %v913_v43  ;;  %v1308_v47 = vpop.f32.mrb[11].mxu1 }
 0x12c   : > { %1427 = vst [vmem:[%s3976_s26 + $0x2a8] sm:$0xff] %v1308_v47 }
 0x12d   : > { %v2836_v54 = vpop.f32.mrb[12].mxu0 }
 0x12e   : > { %1035 = vst [vmem:[%s3976_s26 + $0x360] sm:$0xff] %v2836_v54  ;;  %v2900_v58 = vpop.f32.mrb[12].mxu1  ;;  %v923_v59 = vpop.f32.mrb[13].mxu0 }
 0x12f   : > { %1430 = vst [vmem:[%s3976_s26 + $0x368] sm:$0xff] %v2900_v58  ;;  %1034 = vst [vmem:[%s3976_s26 + $0x320] sm:$0xff] %v923_v59  ;;  %v1318_v63 = vpop.f32.mrb[13].mxu1 }
 0x130   : > { %1429 = vst [vmem:[%s3976_s26 + $0x328] sm:$0xff] %v1318_v63 }
 0x131   : > { %v2839_v6 = vpop.f32.mrb[14].mxu0 }
 0x132   : > { %1037 = vst [vmem:[%s3976_s26 + $0x3e0] sm:$0xff] %v2839_v6  ;;  %v2903_v10 = vpop.f32.mrb[14].mxu1  ;;  %v933_v11 = vpop.f32.mrb[15].mxu0 }
 0x133   : > { %1432 = vst [vmem:[%s3976_s26 + $0x3e8] sm:$0xff] %v2903_v10  ;;  %1036 = vst [vmem:[%s3976_s26 + $0x3a0] sm:$0xff] %v933_v11  ;;  %v1328_v15 = vpop.f32.mrb[15].mxu1 }
 0x134   : > { %1431 = vst [vmem:[%s3976_s26 + $0x3a8] sm:$0xff] %v1328_v15 }
 0x135   : > { %v2842_v22 = vpop.f32.mrb[16].mxu0 }
 0x136   : > { %1039 = vst [vmem:[%s3976_s26 + $0x460] sm:$0xff] %v2842_v22  ;;  %v2906_v26 = vpop.f32.mrb[16].mxu1  ;;  %v943_v27 = vpop.f32.mrb[17].mxu0 }
 0x137   : > { %1434 = vst [vmem:[%s3976_s26 + $0x468] sm:$0xff] %v2906_v26  ;;  %1038 = vst [vmem:[%s3976_s26 + $0x420] sm:$0xff] %v943_v27  ;;  %v1338_v31 = vpop.f32.mrb[17].mxu1 }
 0x138   : > { %1433 = vst [vmem:[%s3976_s26 + $0x428] sm:$0xff] %v1338_v31 }
 0x139   : > { %v2845_v38 = vpop.f32.mrb[18].mxu0 }
 0x13a   : > { %1041 = vst [vmem:[%s3976_s26 + $0x4e0] sm:$0xff] %v2845_v38  ;;  %v2909_v42 = vpop.f32.mrb[18].mxu1  ;;  %v953_v43 = vpop.f32.mrb[19].mxu0 }
 0x13b   : > { %1436 = vst [vmem:[%s3976_s26 + $0x4e8] sm:$0xff] %v2909_v42  ;;  %1040 = vst [vmem:[%s3976_s26 + $0x4a0] sm:$0xff] %v953_v43  ;;  %v1348_v47 = vpop.f32.mrb[19].mxu1 }
 0x13c   : > { %1435 = vst [vmem:[%s3976_s26 + $0x4a8] sm:$0xff] %v1348_v47 }
 0x13d   : > { %v2848_v54 = vpop.f32.mrb[20].mxu0 }
 0x13e   : > { %1043 = vst [vmem:[%s3976_s26 + $0x560] sm:$0xff] %v2848_v54  ;;  %v2912_v57 = vpop.f32.mrb[20].mxu1  ;;  %v963_v58 = vpop.f32.mrb[21].mxu0 }
 0x13f   : > { %1438 = vst [vmem:[%s3976_s26 + $0x568] sm:$0xff] %v2912_v57  ;;  %1042 = vst [vmem:[%s3976_s26 + $0x520] sm:$0xff] %v963_v58  ;;  %v1358_v59 = vpop.f32.mrb[21].mxu1 }
 0x140   : > { %1437 = vst [vmem:[%s3976_s26 + $0x528] sm:$0xff] %v1358_v59 }
 0x141   : > { %v2851_v60 = vpop.f32.mrb[22].mxu0 }
 0x142   : > { %1045 = vst [vmem:[%s3976_s26 + $0x5e0] sm:$0xff] %v2851_v60  ;;  %v2915_v61 = vpop.f32.mrb[22].mxu1  ;;  %v973_v62 = vpop.f32.mrb[23].mxu0 }
 0x143   : > { %1440 = vst [vmem:[%s3976_s26 + $0x5e8] sm:$0xff] %v2915_v61  ;;  %1044 = vst [vmem:[%s3976_s26 + $0x5a0] sm:$0xff] %v973_v62  ;;  %v1368_v63 = vpop.f32.mrb[23].mxu1 }
 0x144   : > { %1439 = vst [vmem:[%s3976_s26 + $0x5a8] sm:$0xff] %v1368_v63 }
 0x145   : > { %v2854_v0 = vpop.f32.mrb[24].mxu0 }
 0x146   : > { %1047 = vst [vmem:[%s3976_s26 + $0x660] sm:$0xff] %v2854_v0  ;;  %v2918_v1 = vpop.f32.mrb[24].mxu1  ;;  %v983_v2 = vpop.f32.mrb[25].mxu0 }
 0x147   : > { %1442 = vst [vmem:[%s3976_s26 + $0x668] sm:$0xff] %v2918_v1  ;;  %1046 = vst [vmem:[%s3976_s26 + $0x620] sm:$0xff] %v983_v2  ;;  %v1378_v3 = vpop.f32.mrb[25].mxu1 }
 0x148   : > { %1441 = vst [vmem:[%s3976_s26 + $0x628] sm:$0xff] %v1378_v3 }
 0x149   : > { %v2857_v4 = vpop.f32.mrb[26].mxu0 }
 0x14a   : > { %1049 = vst [vmem:[%s3976_s26 + $0x6e0] sm:$0xff] %v2857_v4  ;;  %v2921_v5 = vpop.f32.mrb[26].mxu1  ;;  %v993_v6 = vpop.f32.mrb[27].mxu0 }
 0x14b   : > { %1444 = vst [vmem:[%s3976_s26 + $0x6e8] sm:$0xff] %v2921_v5  ;;  %1048 = vst [vmem:[%s3976_s26 + $0x6a0] sm:$0xff] %v993_v6  ;;  %v1388_v7 = vpop.f32.mrb[27].mxu1 }
 0x14c   : > { %1443 = vst [vmem:[%s3976_s26 + $0x6a8] sm:$0xff] %v1388_v7 }
 0x14d   : > { %v2860_v8 = vpop.f32.mrb[28].mxu0 }
 0x14e   : > { %1051 = vst [vmem:[%s3976_s26 + $0x760] sm:$0xff] %v2860_v8  ;;  %v2924_v9 = vpop.f32.mrb[28].mxu1  ;;  %v1003_v10 = vpop.f32.mrb[29].mxu0 }
 0x14f   : > { %1446 = vst [vmem:[%s3976_s26 + $0x768] sm:$0xff] %v2924_v9  ;;  %1050 = vst [vmem:[%s3976_s26 + $0x720] sm:$0xff] %v1003_v10  ;;  %v1398_v11 = vpop.f32.mrb[29].mxu1 }
 0x150   : > { %1445 = vst [vmem:[%s3976_s26 + $0x728] sm:$0xff] %v1398_v11 }
 0x151   : > { %v2863_v12 = vpop.f32.mrb[30].mxu0 }
 0x152   : > { %1053 = vst [vmem:[%s3976_s26 + $0x7e0] sm:$0xff] %v2863_v12  ;;  %v2927_v13 = vpop.f32.mrb[30].mxu1  ;;  %v1013_v14 = vpop.f32.mrb[31].mxu0 }
 0x153   : > { %1448 = vst [vmem:[%s3976_s26 + $0x7e8] sm:$0xff] %v2927_v13  ;;  %1052 = vst [vmem:[%s3976_s26 + $0x7a0] sm:$0xff] %v1013_v14  ;;  %v1408_v15 = vpop.f32.mrb[31].mxu1 }
 0x154   : > { %1447 = vst [vmem:[%s3976_s26 + $0x7a8] sm:$0xff] %v1408_v15 }
 0x155   : > { %v2946_v16 = vpop.f32.mrb[32].mxu0 }
 0x156   : > { %1813 = vst [vmem:[%s3976_s26 + $0x70] sm:$0xff] %v2946_v16  ;;  %v3010_v17 = vpop.f32.mrb[32].mxu1  ;;  %v1653_v18 = vpop.f32.mrb[33].mxu0 }
 0x157   : > { %2208 = vst [vmem:[%s3976_s26 + $0x78] sm:$0xff] %v3010_v17  ;;  %1812 = vst [vmem:[%s3976_s26 + $0x30] sm:$0xff] %v1653_v18  ;;  %v2048_v19 = vpop.f32.mrb[33].mxu1 }
 0x158   : > { %2207 = vst [vmem:[%s3976_s26 + $0x38] sm:$0xff] %v2048_v19 }
 0x159   : > { %v2949_v20 = vpop.f32.mrb[34].mxu0 }
 0x15a   : > { %1815 = vst [vmem:[%s3976_s26 + $0xf0] sm:$0xff] %v2949_v20  ;;  %v3013_v21 = vpop.f32.mrb[34].mxu1  ;;  %v1663_v22 = vpop.f32.mrb[35].mxu0 }
 0x15b   : > { %2210 = vst [vmem:[%s3976_s26 + $0xf8] sm:$0xff] %v3013_v21  ;;  %1814 = vst [vmem:[%s3976_s26 + $0xb0] sm:$0xff] %v1663_v22  ;;  %v2058_v23 = vpop.f32.mrb[35].mxu1 }
 0x15c   : > { %2209 = vst [vmem:[%s3976_s26 + $0xb8] sm:$0xff] %v2058_v23 }
 0x15d   : > { %v2952_v24 = vpop.f32.mrb[36].mxu0 }
 0x15e   : > { %1817 = vst [vmem:[%s3976_s26 + $0x170] sm:$0xff] %v2952_v24  ;;  %v3016_v25 = vpop.f32.mrb[36].mxu1  ;;  %v1673_v26 = vpop.f32.mrb[37].mxu0 }
 0x15f   : > { %2212 = vst [vmem:[%s3976_s26 + $0x178] sm:$0xff] %v3016_v25  ;;  %1816 = vst [vmem:[%s3976_s26 + $0x130] sm:$0xff] %v1673_v26  ;;  %v2068_v27 = vpop.f32.mrb[37].mxu1 }
 0x160   : > { %2211 = vst [vmem:[%s3976_s26 + $0x138] sm:$0xff] %v2068_v27 }
 0x161   : > { %v2955_v28 = vpop.f32.mrb[38].mxu0 }
 0x162   : > { %1819 = vst [vmem:[%s3976_s26 + $0x1f0] sm:$0xff] %v2955_v28  ;;  %v3019_v29 = vpop.f32.mrb[38].mxu1  ;;  %v1683_v30 = vpop.f32.mrb[39].mxu0 }
 0x163   : > { %2214 = vst [vmem:[%s3976_s26 + $0x1f8] sm:$0xff] %v3019_v29  ;;  %1818 = vst [vmem:[%s3976_s26 + $0x1b0] sm:$0xff] %v1683_v30  ;;  %v2078_v31 = vpop.f32.mrb[39].mxu1 }
 0x164   : > { %2213 = vst [vmem:[%s3976_s26 + $0x1b8] sm:$0xff] %v2078_v31 }
 0x165   : > { %v2958_v32 = vpop.f32.mrb[40].mxu0 }
 0x166   : > { %1821 = vst [vmem:[%s3976_s26 + $0x270] sm:$0xff] %v2958_v32  ;;  %v3022_v33 = vpop.f32.mrb[40].mxu1  ;;  %v1693_v34 = vpop.f32.mrb[41].mxu0 }
 0x167   : > { %2216 = vst [vmem:[%s3976_s26 + $0x278] sm:$0xff] %v3022_v33  ;;  %1820 = vst [vmem:[%s3976_s26 + $0x230] sm:$0xff] %v1693_v34  ;;  %v2088_v35 = vpop.f32.mrb[41].mxu1 }
 0x168   : > { %2215 = vst [vmem:[%s3976_s26 + $0x238] sm:$0xff] %v2088_v35 }
 0x169   : > { %v2961_v36 = vpop.f32.mrb[42].mxu0 }
 0x16a   : > { %1823 = vst [vmem:[%s3976_s26 + $0x2f0] sm:$0xff] %v2961_v36  ;;  %v3025_v37 = vpop.f32.mrb[42].mxu1  ;;  %v1703_v38 = vpop.f32.mrb[43].mxu0 }
 0x16b   : > { %2218 = vst [vmem:[%s3976_s26 + $0x2f8] sm:$0xff] %v3025_v37  ;;  %1822 = vst [vmem:[%s3976_s26 + $0x2b0] sm:$0xff] %v1703_v38  ;;  %v2098_v39 = vpop.f32.mrb[43].mxu1 }
 0x16c   : > { %2217 = vst [vmem:[%s3976_s26 + $0x2b8] sm:$0xff] %v2098_v39 }
 0x16d   : > { %v2964_v40 = vpop.f32.mrb[44].mxu0 }
 0x16e   : > { %1825 = vst [vmem:[%s3976_s26 + $0x370] sm:$0xff] %v2964_v40  ;;  %v3028_v41 = vpop.f32.mrb[44].mxu1  ;;  %v1713_v42 = vpop.f32.mrb[45].mxu0 }
 0x16f   : > { %2220 = vst [vmem:[%s3976_s26 + $0x378] sm:$0xff] %v3028_v41  ;;  %1824 = vst [vmem:[%s3976_s26 + $0x330] sm:$0xff] %v1713_v42  ;;  %v2108_v43 = vpop.f32.mrb[45].mxu1 }
 0x170   : > { %2219 = vst [vmem:[%s3976_s26 + $0x338] sm:$0xff] %v2108_v43 }
 0x171   : > { %v2967_v44 = vpop.f32.mrb[46].mxu0 }
 0x172   : > { %1827 = vst [vmem:[%s3976_s26 + $0x3f0] sm:$0xff] %v2967_v44  ;;  %v3031_v45 = vpop.f32.mrb[46].mxu1  ;;  %v1723_v46 = vpop.f32.mrb[47].mxu0 }
 0x173   : > { %2222 = vst [vmem:[%s3976_s26 + $0x3f8] sm:$0xff] %v3031_v45  ;;  %1826 = vst [vmem:[%s3976_s26 + $0x3b0] sm:$0xff] %v1723_v46  ;;  %v2118_v47 = vpop.f32.mrb[47].mxu1 }
 0x174   : > { %2221 = vst [vmem:[%s3976_s26 + $0x3b8] sm:$0xff] %v2118_v47 }
 0x175   : > { %v2970_v48 = vpop.f32.mrb[48].mxu0 }
 0x176   : > { %1829 = vst [vmem:[%s3976_s26 + $0x470] sm:$0xff] %v2970_v48  ;;  %v3034_v49 = vpop.f32.mrb[48].mxu1  ;;  %v1733_v50 = vpop.f32.mrb[49].mxu0 }
 0x177   : > { %2224 = vst [vmem:[%s3976_s26 + $0x478] sm:$0xff] %v3034_v49  ;;  %1828 = vst [vmem:[%s3976_s26 + $0x430] sm:$0xff] %v1733_v50  ;;  %v2128_v51 = vpop.f32.mrb[49].mxu1 }
 0x178   : > { %2223 = vst [vmem:[%s3976_s26 + $0x438] sm:$0xff] %v2128_v51 }
 0x179   : > { %v2973_v52 = vpop.f32.mrb[50].mxu0 }
 0x17a   : > { %1831 = vst [vmem:[%s3976_s26 + $0x4f0] sm:$0xff] %v2973_v52  ;;  %v3037_v53 = vpop.f32.mrb[50].mxu1  ;;  %v1743_v54 = vpop.f32.mrb[51].mxu0 }
 0x17b   : > { %2226 = vst [vmem:[%s3976_s26 + $0x4f8] sm:$0xff] %v3037_v53  ;;  %1830 = vst [vmem:[%s3976_s26 + $0x4b0] sm:$0xff] %v1743_v54  ;;  %v2138_v55 = vpop.f32.mrb[51].mxu1 }
 0x17c   : > { %2225 = vst [vmem:[%s3976_s26 + $0x4b8] sm:$0xff] %v2138_v55 }
 0x17d   : > { %v2976_v56 = vpop.f32.mrb[52].mxu0 }
 0x17e   : > { %1833 = vst [vmem:[%s3976_s26 + $0x570] sm:$0xff] %v2976_v56  ;;  %v3040_v57 = vpop.f32.mrb[52].mxu1  ;;  %v1753_v58 = vpop.f32.mrb[53].mxu0 }
 0x17f   : > { %2228 = vst [vmem:[%s3976_s26 + $0x578] sm:$0xff] %v3040_v57  ;;  %1832 = vst [vmem:[%s3976_s26 + $0x530] sm:$0xff] %v1753_v58  ;;  %v2148_v59 = vpop.f32.mrb[53].mxu1 }
 0x180   : > { %2227 = vst [vmem:[%s3976_s26 + $0x538] sm:$0xff] %v2148_v59 }
 0x181   : > { %v2979_v60 = vpop.f32.mrb[54].mxu0 }
 0x182   : > { %1835 = vst [vmem:[%s3976_s26 + $0x5f0] sm:$0xff] %v2979_v60  ;;  %v3043_v61 = vpop.f32.mrb[54].mxu1  ;;  %v1763_v62 = vpop.f32.mrb[55].mxu0 }
 0x183   : > { %2230 = vst [vmem:[%s3976_s26 + $0x5f8] sm:$0xff] %v3043_v61  ;;  %1834 = vst [vmem:[%s3976_s26 + $0x5b0] sm:$0xff] %v1763_v62  ;;  %v2158_v63 = vpop.f32.mrb[55].mxu1 }
 0x184   : > { %2229 = vst [vmem:[%s3976_s26 + $0x5b8] sm:$0xff] %v2158_v63 }
 0x185   : > { %v2982_v0 = vpop.f32.mrb[56].mxu0 }
 0x186   : > { %1837 = vst [vmem:[%s3976_s26 + $0x670] sm:$0xff] %v2982_v0  ;;  %v3046_v1 = vpop.f32.mrb[56].mxu1  ;;  %v1773_v2 = vpop.f32.mrb[57].mxu0 }
 0x187   : > { %2232 = vst [vmem:[%s3976_s26 + $0x678] sm:$0xff] %v3046_v1  ;;  %1836 = vst [vmem:[%s3976_s26 + $0x630] sm:$0xff] %v1773_v2  ;;  %v2168_v3 = vpop.f32.mrb[57].mxu1 }
 0x188   : > { %2231 = vst [vmem:[%s3976_s26 + $0x638] sm:$0xff] %v2168_v3 }
 0x189   : > { %v2985_v4 = vpop.f32.mrb[58].mxu0 }
 0x18a   : > { %1839 = vst [vmem:[%s3976_s26 + $0x6f0] sm:$0xff] %v2985_v4  ;;  %v3049_v5 = vpop.f32.mrb[58].mxu1  ;;  %v1783_v6 = vpop.f32.mrb[59].mxu0 }
 0x18b   : > { %2234 = vst [vmem:[%s3976_s26 + $0x6f8] sm:$0xff] %v3049_v5  ;;  %1838 = vst [vmem:[%s3976_s26 + $0x6b0] sm:$0xff] %v1783_v6  ;;  %v2178_v7 = vpop.f32.mrb[59].mxu1 }
 0x18c   : > { %2233 = vst [vmem:[%s3976_s26 + $0x6b8] sm:$0xff] %v2178_v7 }
 0x18d   : > { %v2988_v8 = vpop.f32.mrb[60].mxu0 }
 0x18e   : > { %1841 = vst [vmem:[%s3976_s26 + $0x770] sm:$0xff] %v2988_v8  ;;  %v3052_v9 = vpop.f32.mrb[60].mxu1  ;;  %v1793_v10 = vpop.f32.mrb[61].mxu0 }
 0x18f   : > { %2236 = vst [vmem:[%s3976_s26 + $0x778] sm:$0xff] %v3052_v9  ;;  %1840 = vst [vmem:[%s3976_s26 + $0x730] sm:$0xff] %v1793_v10  ;;  %v2188_v11 = vpop.f32.mrb[61].mxu1 }
 0x190   : > { %2235 = vst [vmem:[%s3976_s26 + $0x738] sm:$0xff] %v2188_v11 }
 0x191   : > { %v2991_v12 = vpop.f32.mrb[62].mxu0 }
 0x192   : > { %1843 = vst [vmem:[%s3976_s26 + $0x7f0] sm:$0xff] %v2991_v12  ;;  %v3055_v13 = vpop.f32.mrb[62].mxu1  ;;  %v1803_v14 = vpop.f32.mrb[63].mxu0 }
 0x193   : > { %2238 = vst [vmem:[%s3976_s26 + $0x7f8] sm:$0xff] %v3055_v13  ;;  %1842 = vst [vmem:[%s3976_s26 + $0x7b0] sm:$0xff] %v1803_v14  ;;  %v2198_v15 = vpop.f32.mrb[63].mxu1 }
 0x194   : > { %2237 = vst [vmem:[%s3976_s26 + $0x7b8] sm:$0xff] %v2198_v15 }
 0x195   : > { %3190 = shalt.err (!%p3187_p8)
}
 0x196   : > { %s3191_s9 = scalar_lea.hbm %s4357_s4, 32768  ;;  %s3195_s19 = scalar_lea.hbm %s4415_s3, 65536 }
 0x197   : > { %p3192_p11 = scmp.ne.s32.totalorder %s4357_s4, %s3191_s9  ;;  %p3196_p0 = scmp.lt.u32.totalorder %s4357_s4, %s4415_s3 }
 0x198   : > { %p3197_p1 = scmp.lt.u32.totalorder %s3195_s19, %s3191_s9  ;;  %p3199_p3 = scmp.lt.u32.totalorder %s3191_s9, %s4357_s4 }
 0x199   : > { %p3193_p12 = pnand %p3192_p11, %p3319_p5 }
 0x19a   : > { %p3198_p2 = por %p3197_p1, %p3196_p0 }
 0x19b   : > { %p3194_p13 = pneg %p3193_p12 }
 0x19c   : > { %p3200_p4 = por %p3199_p3, %p3198_p2 }
 0x19e   : > { %p3201_p6 = pnand %p3200_p4, %p3194_p13 }
 0x1a0   : > { %3204 = shalt.err (!%p3201_p6)
}
 0x1a1   : > { %s3258_s26 = smov 1024   ;;  %s3259_s27 = smov 64  }
 0x1a2   : > { %3120 = dma.vmem_to_hbm [thread:$0]  (%p3319_p5), %s4359_s28, 32768, %s4357_s4, %s2240_s15, %s3258_s26, %s3258_s26, %s3259_s27  }
 0x1a3 PF: > { %s2271_s29 = sand.u32 1, %s3235_s12   ;;  %p3123_p7 = pnand %p2375_p10, %p3330_p9 }
 0x1a4   : > { %s2272_s30 = scalar_lea.sflag [#allocation4], %s2271_s29 }
 0x1a5   : > { %3230 = dma.done.wait (!%p3123_p7), %s2272_s30, 32768  }
 0x1a6   : > { %3232 = vsyncadd (!%p3123_p7), %s2272_s30, 4294934528  ;;  %s16_s17 = sadd.s32 1, %s3255_s17   ;;  %s4418_s12 = smov %s3239_s13 }
 0x1a7   : > { %p13_p8 = scmp.ge.s32.totalorder %s16_s17, 4   ;;  %s4419_s13 = smov %s3243_s14 }
 0x1a8   : > { %s4420_s14 = smov %s3328_s24  ;;  %s4421_s15 = smov %s3251_s16 }
 0x1a9   : > { %s4422_s16 = smov %s4424_s20  ;;  %15 = sbr.rel (!%p13_p8) target bundleno = 4 (0x4), region = 122 }
 0x1b0   :  { %2277 = vsyncpa [#allocation4], 1 }
 0x1b1   :  { %2279 = vsyncpa [#allocation4 + $0x1], 1 }

</bundles_post_ra>
